<compile_context>
chip_gen: v6e
topology: v6e:2x2x1
jax: 0.10.0
libtpu: 0.0.40
codegen_flags: <defaults>
</compile_context>

<pallas_src>
import math

import numpy as np
import jax
import jax.numpy as jnp
from jax.experimental import pallas as pl
from jax.experimental.pallas import tpu as pltpu

# ---------------------------------------------------------------- config ----
B = 2              # batch size
QUES_DIM = 128     # config.ques_dim
NODE_DIM = 128     # config.img_node_dim == config.kg_node_dim == hidden_size
EDGE_DIM = 128     # config.edge_dim
HIDDEN = 128       # config.hidden_size
NUM_HEADS = 4      # config.num_heads
HEAD_DIM = 32      # config.hidden_size_head
MID = 128          # config.mid_size (must equal HIDDEN for the uniform slab)
N_IMG, N_KG = 8, 8   # nodes per graph (stacked layout assumes N_IMG == N_KG)
E_IMG, E_KG = 8, 8   # edges per graph

NVEC = 12                  # per-direction 128-wide bias / LN rows
W_COLS = 8 * HIDDEN        # per-direction weight slab: [128, 1024] bf16
# column offsets inside the slab (all multiples of 128 lanes)
C_QPROJ = 0                # [Dq, 2D]  merged ques->q-side | ques->kv-side
C_WQ = 2 * HIDDEN          # [D, D]    wq * (1/sqrt(head_dim))  (scale folded)
C_WKV = 3 * HIDDEN         # [D, 2D]   merged wk | wv
C_WO = 5 * HIDDEN          # [D, D]    wo
C_W1 = 6 * HIDDEN          # [D, D]    ffn w1
C_W2 = 7 * HIDDEN          # [D, D]    ffn w2


def _layer_norm(x, gamma, beta, eps=1e-5):
    mu = jnp.mean(x, axis=-1, keepdims=True)
    var = jnp.mean((x - mu) ** 2, axis=-1, keepdims=True)
    return (x - mu) * jax.lax.rsqrt(var + eps) * gamma + beta


# --------------------------------------------- fused cross-graph attention --
# Per grid step d (direction): question projections + tanh fuse + multi-head
# cross attention + FFN + LayerNorms + residual with ORIGINAL node features +
# per-row L2 normalize, all on M = B*N rows.
#
# Weight slab  W[d] : [128, 1024] bf16, columns laid out per C_* offsets.
# Vector stack V[d] : [NVEC, 128] f32
#   0 q-ques b, 1 kv-ques b, 2 bq*scale, 3 bk, 4 bv, 5 bo,
#   6 ln1g, 7 ln1b, 8 b1, 9 b2, 10 ln2g, 11 ln2b
def fused_cross_kernel(qn_ref, kvn_ref, ques_ref, mask_ref, w_ref, b_ref, o_ref):
    Bq, N, D = qn_ref.shape[1], qn_ref.shape[2], qn_ref.shape[3]
    M = Bq * N

    Wm = w_ref[0]                          # [D, 1024] bf16
    bv = b_ref[0]                          # [NVEC, D] f32
    mask = mask_ref[...]                   # [M, M] f32 additive bias (0 / -1e30)
    ques16 = ques_ref[...].astype(jnp.bfloat16)   # [B, Dq]
    nodes_q = qn_ref[0]                    # [B, N, D] f32 (original node feats)
    nodes_kv = kvn_ref[0]                  # [B, N, D] f32

    # merged question projections: ONE [Dq, 2D] weight load
    qp = jnp.dot(ques16, Wm[:, C_QPROJ:C_QPROJ + 2 * D],
                 preferred_element_type=jnp.float32)          # [B, 2D]
    qp_q = qp[:, :D] + bv[0]
    qp_kv = qp[:, D:] + bv[1]

    # tanh(question_proj + node_feats); batch flattened into M rows (f32 EUP)
    q_feat = jnp.tanh(qp_q[:, None, :] + nodes_q).reshape(M, D)
    kv_feat = jnp.tanh(qp_kv[:, None, :] + nodes_kv).reshape(M, D)
    q16 = q_feat.astype(jnp.bfloat16)       # cast once, reuse
    kv16 = kv_feat.astype(jnp.bfloat16)

    # projections: Q (scale pre-folded into weights/bias), merged K|V
    Q = jnp.dot(q16, Wm[:, C_WQ:C_WQ + D],
                preferred_element_type=jnp.float32) + bv[2]
    KV = jnp.dot(kv16, Wm[:, C_WKV:C_WKV + 2 * D],
                 preferred_element_type=jnp.float32)
    K = KV[:, :D] + bv[3]
    V = KV[:, D:] + bv[4]
    Q16 = Q.astype(jnp.bfloat16)
    K16 = K.astype(jnp.bfloat16)
    V16 = V.astype(jnp.bfloat16)

    # multi-head cross attention: unrolled per-head 2-D dots, M stays leading,
    # no [M,H,d] <-> [H,M,d] relayouts; head merge = contiguous lane concat.
    nt_dims = (((1,), (1,)), ((), ()))      # contract last dims (q @ k^T)
    parts = []
    for h in range(NUM_HEADS):
        sl = slice(h * HEAD_DIM, (h + 1) * HEAD_DIM)
        s = jax.lax.dot_general(Q16[:, sl], K16[:, sl], nt_dims,
                                preferred_element_type=jnp.float32)   # [M, M]
        s = s + mask                                   # constant additive mask
        e = jnp.exp(s - jnp.max(s, axis=-1, keepdims=True))
        p = e * pl.reciprocal(jnp.sum(e, axis=-1, keepdims=True), approx=True)
        parts.append(jnp.dot(p.astype(jnp.bfloat16), V16[:, sl],
                             preferred_element_type=jnp.float32))     # [M, d]
    att = jnp.concatenate(parts, axis=-1)                             # [M, D]

    att = jnp.dot(att.astype(jnp.bfloat16), Wm[:, C_WO:C_WO + D],
                  preferred_element_type=jnp.float32) + bv[5]

    x = _layer_norm(q_feat + att, bv[6], bv[7])
    x16 = x.astype(jnp.bfloat16)
    ffn = jnp.maximum(
        jnp.dot(x16, Wm[:, C_W1:C_W1 + D],
                preferred_element_type=jnp.float32) + bv[8], 0.0)
    y = jnp.dot(ffn.astype(jnp.bfloat16), Wm[:, C_W2:C_W2 + D],
                preferred_element_type=jnp.float32) + bv[9]
    y = _layer_norm(x + y, bv[10], bv[11])

    # GATQGCLayer epilogue: residual with ORIGINAL node feats + F.normalize
    res = nodes_q.reshape(M, D) + y
    inv = jax.lax.rsqrt(jnp.maximum(jnp.sum(res * res, axis=-1, keepdims=True),
                                    1e-24))   # == 1 / max(||res||_2, 1e-12)
    o_ref[0] = (res * inv).reshape(Bq, N, D).astype(o_ref.dtype)


def cross_graph_fused(packed, question, img_nodes, kg_nodes):
    Bq, Dq = question.shape
    _, N, D = img_nodes.shape
    assert img_nodes.shape[1] == kg_nodes.shape[1], \
        "stacked-direction layout assumes equal node counts (pad otherwise)"
    M = Bq * N

    # direction 0: img queries / kg keys+values; direction 1: swapped
    qn = jnp.stack([img_nodes, kg_nodes])    # [2, B, N, D]
    kvn = jnp.stack([kg_nodes, img_nodes])   # [2, B, N, D]

    # trace-time constant additive mask: 0 within a batch, -1e30 across batches
    blk = np.kron(np.eye(Bq, dtype=np.float32), np.ones((N, N), np.float32))
    mask = jnp.asarray(np.where(blk > 0.0, 0.0, -1e30).astype(np.float32))

    # advisory cost estimate (helps XLA schedule around the tiny custom call)
    mm_flops = 2 * (Bq * Dq * 2 * D          # merged question projections
                    + M * D * D              # wq
                    + M * D * 2 * D          # merged wk|wv
                    + 3 * M * D * D          # wo, w1, w2
                    + 2 * NUM_HEADS * M * M * HEAD_DIM)  # scores + ctx
    flops = 2 * mm_flops
    transc = 2 * (2 * M * D + NUM_HEADS * M * M + NUM_HEADS * M + 3 * M)
    bytes_acc = ((qn.size + kvn.size + question.size + mask.size) * 4
                 + packed["W"].size * 2 + packed["V"].size * 4
                 + 2 * Bq * N * D * 4)

    out = pl.pallas_call(
        fused_cross_kernel,
        out_shape=jax.ShapeDtypeStruct((2, Bq, N, D), jnp.float32),
        grid=(2,),
        in_specs=[
            pl.BlockSpec((1, Bq, N, D), lambda d: (d, 0, 0, 0)),
            pl.BlockSpec((1, Bq, N, D), lambda d: (d, 0, 0, 0)),
            pl.BlockSpec((Bq, Dq), lambda d: (0, 0)),
            pl.BlockSpec((M, M), lambda d: (0, 0)),
            pl.BlockSpec((1, D, W_COLS), lambda d: (d, 0, 0)),
            pl.BlockSpec((1, NVEC, D), lambda d: (d, 0, 0)),
        ],
        out_specs=pl.BlockSpec((1, Bq, N, D), lambda d: (d, 0, 0, 0)),
        compiler_params=pltpu.CompilerParams(
            dimension_semantics=("parallel",)),   # both TCs on v7x
        cost_estimate=pl.CostEstimate(flops=flops, transcendentals=transc,
                                      bytes_accessed=bytes_acc),
    )(qn, kvn, question, mask, packed["W"], packed["V"])
    return out[0], out[1]


# ----------------------------------------------------------------- forward --
def gat_qgc_layer_forward(packed, question, img_nodes, img_edges,
                          kg_nodes, kg_edges):
    Bq = question.shape[0]

    # 1) Question-guided graph attention: softmax over a size-1 axis is exactly
    #    1.0 and the identity GNN stage never reads it -> emitted as constants
    #    (flagged; see module docstring TODO).
    img_natt = jnp.ones((Bq, img_nodes.shape[1]), jnp.float32)
    img_eatt = jnp.ones((Bq, img_edges.shape[1]), jnp.float32)
    kg_natt = jnp.ones((Bq, kg_nodes.shape[1]), jnp.float32)
    kg_eatt = jnp.ones((Bq, kg_edges.shape[1]), jnp.float32)

    # 2) GNN stage (ImgGCN / FactGCN) — identity on node features (see TODO).
    # 3)+4) Cross-graph attention + residual + L2 normalize, fused in one kernel.
    img_final, kg_final = cross_graph_fused(packed, question, img_nodes, kg_nodes)
    return img_final, kg_final, img_natt, img_eatt, kg_natt, kg_eatt


# ------------------------------------------------------------------ params --
def init_params(key):
    keys = iter(jax.random.split(key, 64))

    def lin(in_d, out_d):
        k1, k2 = jax.random.split(next(keys))
        bound = 1.0 / math.sqrt(in_d)
        w = jax.random.uniform(k1, (in_d, out_d), jnp.float32, -bound, bound)
        b = jax.random.uniform(k2, (1, out_d), jnp.float32, -bound, bound)
        return w, b

    def qg_params():
        # Kept for parameter-structure fidelity with the torch module; not
        # consumed by the forward pass (its output is the constant 1.0).
        p = {}
        p["wqn"], p["bqn"] = lin(QUES_DIM, HIDDEN)
        p["wn"], p["bn"] = lin(NODE_DIM, HIDDEN)
        p["wnv"], p["bnv"] = lin(HIDDEN, 1)
        p["wqe"], p["bqe"] = lin(QUES_DIM, HIDDEN)
        p["we"], p["be"] = lin(EDGE_DIM, HIDDEN)
        p["wev"], p["bev"] = lin(HIDDEN, 1)
        return p

    def cross_block():
        p = {}
        p["wq"], p["bq"] = lin(HIDDEN, HIDDEN)
        p["wk"], p["bk"] = lin(HIDDEN, HIDDEN)
        p["wv"], p["bv"] = lin(HIDDEN, HIDDEN)
        p["wo"], p["bo"] = lin(HIDDEN, HIDDEN)
        p["ln1g"] = jnp.ones((1, HIDDEN), jnp.float32)
        p["ln1b"] = jnp.zeros((1, HIDDEN), jnp.float32)
        p["w1"], p["b1"] = lin(HIDDEN, MID)
        p["w2"], p["b2"] = lin(MID, HIDDEN)
        p["ln2g"] = jnp.ones((1, HIDDEN), jnp.float32)
        p["ln2b"] = jnp.zeros((1, HIDDEN), jnp.float32)
        return p

    cross = {}
    cross["ques_img_w"], cross["ques_img_b"] = lin(QUES_DIM, NODE_DIM)
    cross["ques_kg_w"], cross["ques_kg_b"] = lin(QUES_DIM, NODE_DIM)
    cross["img_to_kg"] = cross_block()
    cross["kg_to_img"] = cross_block()
    return {"qg_img": qg_params(), "qg_kg": qg_params(), "cross": cross}


def pack_cross_params(params):
    """One-time packing of the cross-attention weights into direction-stacked
    slabs: W [2, 128, 1024] bf16 (MXU operands, merged qproj and wk|wv, scale
    folded into wq), V [2, NVEC, 128] f32 (bq pre-scaled)."""
    assert MID == HIDDEN == QUES_DIM == NODE_DIM, \
        "uniform [128, 1024] slab requires ques/node/mid dims == hidden"
    c = params["cross"]
    scale = 1.0 / math.sqrt(HEAD_DIM)

    def slab(blk, qw_q, qw_kv):
        # columns: [qproj_q | qproj_kv | wq*scale | wk | wv | wo | w1 | w2]
        return jnp.concatenate(
            [qw_q, qw_kv, blk["wq"] * scale, blk["wk"], blk["wv"],
             blk["wo"], blk["w1"], blk["w2"]], axis=1)

    def vecs(blk, qb_q, qb_kv):
        rows = [qb_q, qb_kv, blk["bq"] * scale, blk["bk"], blk["bv"], blk["bo"],
                blk["ln1g"], blk["ln1b"], blk["b1"], blk["b2"],
                blk["ln2g"], blk["ln2b"]]
        return jnp.stack([r.reshape(-1) for r in rows])

    W = jnp.stack([
        slab(c["img_to_kg"], c["ques_img_w"], c["ques_kg_w"]),
        slab(c["kg_to_img"], c["ques_kg_w"], c["ques_img_w"]),
    ]).astype(jnp.bfloat16)                                   # [2, 128, 1024]
    V = jnp.stack([
        vecs(c["img_to_kg"], c["ques_img_b"], c["ques_kg_b"]),
        vecs(c["kg_to_img"], c["ques_kg_b"], c["ques_img_b"]),
    ]).astype(jnp.float32)                                    # [2, NVEC, 128]
    return {"W": W, "V": V}


# ----------------------------------------------------- pure-JAX reference --
def reference_cross(params, question, img_nodes, kg_nodes):
    """Per-batch-loop reference with the same bf16 operand casts (scale applied
    to the scores the conventional way, exact softmax divide)."""
    c = params["cross"]
    bf = lambda x: x.astype(jnp.bfloat16)

    def mm(x, w, b):
        return jnp.dot(bf(x), bf(w), preferred_element_type=jnp.float32) + b.reshape(-1)

    def cross_block(blk, q_feat, kv_feat):
        Q = mm(q_feat, blk["wq"], blk["bq"])
        K = mm(kv_feat, blk["wk"], blk["bk"])
        V = mm(kv_feat, blk["wv"], blk["bv"])
        Nq, Nk = q_feat.shape[0], kv_feat.shape[0]
        qh = Q.reshape(Nq, NUM_HEADS, HEAD_DIM).transpose(1, 0, 2)
        kh = K.reshape(Nk, NUM_HEADS, HEAD_DIM).transpose(1, 0, 2)
        vh = V.reshape(Nk, NUM_HEADS, HEAD_DIM).transpose(1, 0, 2)
        s = jnp.einsum('hqd,hkd->hqk', bf(qh), bf(kh),
                       preferred_element_type=jnp.float32) / math.sqrt(HEAD_DIM)
        p = jax.nn.softmax(s, axis=-1)
        ctx = jnp.einsum('hqk,hkd->hqd', bf(p), bf(vh),
                         preferred_element_type=jnp.float32)
        att = mm(ctx.transpose(1, 0, 2).reshape(Nq, HIDDEN), blk["wo"], blk["bo"])
        x = _layer_norm(q_feat + att, blk["ln1g"].reshape(-1), blk["ln1b"].reshape(-1))
        f = jnp.maximum(mm(x, blk["w1"], blk["b1"]), 0.0)
        return _layer_norm(x + mm(f, blk["w2"], blk["b2"]),
                           blk["ln2g"].reshape(-1), blk["ln2b"].reshape(-1))

    q_img = mm(question, c["ques_img_w"], c["ques_img_b"])
    q_kg = mm(question, c["ques_kg_w"], c["ques_kg_b"])
    img_outs, kg_outs = [], []
    for b in range(question.shape[0]):
        img_feat = jnp.tanh(q_img[b][None, :] + img_nodes[b])
        kg_feat = jnp.tanh(q_kg[b][None, :] + kg_nodes[b])
        img_outs.append(cross_block(c["img_to_kg"], img_feat, kg_feat))
        kg_outs.append(cross_block(c["kg_to_img"], kg_feat, img_feat))

    def resnorm(orig, new):
        x = orig + new
        n = jnp.sqrt(jnp.sum(x * x, axis=-1, keepdims=True))
        return x / jnp.maximum(n, 1e-12)

    return (resnorm(img_nodes, jnp.stack(img_outs)),
            resnorm(kg_nodes, jnp.stack(kg_outs)))


# -------------------------------------------------------------------- main --
if __name__ == "__main__":
    key = jax.random.PRNGKey(0)
    kq, kin, kie, kkn, kke, kp = jax.random.split(key, 6)
    question = jax.random.normal(kq, (B, QUES_DIM), jnp.float32)
    img_nodes = jax.random.normal(kin, (B, N_IMG, NODE_DIM), jnp.float32)
    img_edges = jax.random.normal(kie, (B, E_IMG, EDGE_DIM), jnp.float32)
    kg_nodes = jax.random.normal(kkn, (B, N_KG, NODE_DIM), jnp.float32)
    kg_edges = jax.random.normal(kke, (B, E_KG, EDGE_DIM), jnp.float32)

    params = init_params(kp)
    packed = pack_cross_params(params)

    fwd = jax.jit(gat_qgc_layer_forward)
    outs = jax.block_until_ready(
        fwd(packed, question, img_nodes, img_edges, kg_nodes, kg_edges))
    img_final, kg_final, img_natt, img_eatt, kg_natt, kg_eatt = outs

    assert img_final.shape == (B, N_IMG, NODE_DIM)
    assert kg_final.shape == (B, N_KG, NODE_DIM)
    assert bool(jnp.all(jnp.isfinite(img_final))) and bool(jnp.all(jnp.isfinite(kg_final)))
    # Reference softmax over a size-1 axis -> attention values are exactly 1.
    assert bool(jnp.allclose(img_natt, 1.0)) and bool(jnp.allclose(kg_eatt, 1.0))
    # Output node features are L2-normalized per row.
    assert bool(jnp.allclose(jnp.linalg.norm(img_final, axis=-1), 1.0, atol=1e-3))
    assert bool(jnp.allclose(jnp.linalg.norm(kg_final, axis=-1), 1.0, atol=1e-3))

    # Pure-JAX reference check for the fused cross-attention path.
    ref_img, ref_kg = reference_cross(params, question, img_nodes, kg_nodes)
    assert bool(jnp.max(jnp.abs(img_final - ref_img)) < 3e-2)
    assert bool(jnp.max(jnp.abs(kg_final - ref_kg)) < 3e-2)

    print("KERNEL_OK")
</pallas_src>

<mosaic_0001>
module attributes {stable_mosaic.version = 11 : i64} {
  func.func @fused_cross_kernel(%arg0: i32, %arg1: memref<1x2x8x128xf32, #tpu.memory_space<vmem>>, %arg2: memref<1x2x8x128xf32, #tpu.memory_space<vmem>>, %arg3: memref<2x128xf32, #tpu.memory_space<vmem>>, %arg4: memref<16x16xf32, #tpu.memory_space<vmem>>, %arg5: memref<1x128x1024xbf16, #tpu.memory_space<vmem>>, %arg6: memref<1x12x128xf32, #tpu.memory_space<vmem>>, %arg7: memref<1x2x8x128xf32, #tpu.memory_space<vmem>>) attributes {dimension_semantics = [#tpu.dimension_semantics<parallel>], iteration_bounds = array<i64: 2>, scalar_prefetch = 0 : i64, scratch_operands = 0 : i64, tpu.core_type = #tpu.core_type<tc>, window_params = [{transform_indices = @transform_0, window_bounds = array<i64: 1, 2, 8, 128>}, {transform_indices = @transform_1, window_bounds = array<i64: 1, 2, 8, 128>}, {pipeline_mode = #tpu.pipeline_mode<synchronous>, transform_indices = @transform_2, window_bounds = array<i64: 2, 128>}, {pipeline_mode = #tpu.pipeline_mode<synchronous>, transform_indices = @transform_3, window_bounds = array<i64: 16, 16>}, {transform_indices = @transform_4, window_bounds = array<i64: 1, 128, 1024>}, {transform_indices = @transform_5, window_bounds = array<i64: 1, 12, 128>}, {transform_indices = @transform_6, window_bounds = array<i64: 1, 2, 8, 128>}]} {
    %c0 = arith.constant 0 : index
    %c0_0 = arith.constant 0 : index
    %c0_1 = arith.constant 0 : index
    %0 = vector.load %arg5[%c0, %c0_0, %c0_1] : memref<1x128x1024xbf16, #tpu.memory_space<vmem>>, vector<1x128x1024xbf16>
    %1 = vector.shape_cast %0 : vector<1x128x1024xbf16> to vector<128x1024xbf16>
    %c0_2 = arith.constant 0 : index
    %c0_3 = arith.constant 0 : index
    %c0_4 = arith.constant 0 : index
    %2 = vector.load %arg6[%c0_2, %c0_3, %c0_4] : memref<1x12x128xf32, #tpu.memory_space<vmem>>, vector<1x12x128xf32>
    %3 = vector.shape_cast %2 : vector<1x12x128xf32> to vector<12x128xf32>
    %c0_5 = arith.constant 0 : index
    %c0_6 = arith.constant 0 : index
    %4 = vector.load %arg4[%c0_5, %c0_6] : memref<16x16xf32, #tpu.memory_space<vmem>>, vector<16x16xf32>
    %c0_7 = arith.constant 0 : index
    %c0_8 = arith.constant 0 : index
    %5 = vector.load %arg3[%c0_7, %c0_8] : memref<2x128xf32, #tpu.memory_space<vmem>>, vector<2x128xf32>
    %6 = arith.truncf %5 : vector<2x128xf32> to vector<2x128xbf16>
    %c0_9 = arith.constant 0 : index
    %c0_10 = arith.constant 0 : index
    %c0_11 = arith.constant 0 : index
    %c0_12 = arith.constant 0 : index
    %7 = vector.load %arg1[%c0_9, %c0_10, %c0_11, %c0_12] : memref<1x2x8x128xf32, #tpu.memory_space<vmem>>, vector<1x2x8x128xf32>
    %8 = vector.shape_cast %7 : vector<1x2x8x128xf32> to vector<2x8x128xf32>
    %c0_13 = arith.constant 0 : index
    %c0_14 = arith.constant 0 : index
    %c0_15 = arith.constant 0 : index
    %c0_16 = arith.constant 0 : index
    %9 = vector.load %arg2[%c0_13, %c0_14, %c0_15, %c0_16] : memref<1x2x8x128xf32, #tpu.memory_space<vmem>>, vector<1x2x8x128xf32>
    %10 = vector.shape_cast %9 : vector<1x2x8x128xf32> to vector<2x8x128xf32>
    %11 = vector.extract_strided_slice %1 {offsets = [0, 0], sizes = [128, 256], strides = [1, 1]} : vector<128x1024xbf16> to vector<128x256xbf16>
    %cst = arith.constant dense<0.000000e+00> : vector<2x256xf32>
    %12 = tpu.matmul %6, %11, %cst {dimension_numbers = #tpu.dot_dimension_numbers<[1], [0], [0], [1], [0, 0, 1, 1], [], []>} : vector<2x128xbf16>, vector<128x256xbf16>, vector<2x256xf32> -> vector<2x256xf32>
    %13 = vector.extract_strided_slice %12 {offsets = [0, 0], sizes = [2, 128], strides = [1, 1]} : vector<2x256xf32> to vector<2x128xf32>
    %14 = vector.extract_strided_slice %3 {offsets = [0, 0], sizes = [1, 128], strides = [1, 1]} : vector<12x128xf32> to vector<1x128xf32>
    %15 = vector.shape_cast %14 : vector<1x128xf32> to vector<128xf32>
    %16 = vector.shape_cast %15 : vector<128xf32> to vector<1x128xf32>
    %17 = vector.broadcast %16 : vector<1x128xf32> to vector<2x128xf32>
    %18 = arith.addf %13, %17 : vector<2x128xf32>
    %19 = vector.extract_strided_slice %12 {offsets = [0, 128], sizes = [2, 128], strides = [1, 1]} : vector<2x256xf32> to vector<2x128xf32>
    %20 = vector.extract_strided_slice %3 {offsets = [1, 0], sizes = [1, 128], strides = [1, 1]} : vector<12x128xf32> to vector<1x128xf32>
    %21 = vector.shape_cast %20 : vector<1x128xf32> to vector<128xf32>
    %22 = vector.shape_cast %21 : vector<128xf32> to vector<1x128xf32>
    %23 = vector.broadcast %22 : vector<1x128xf32> to vector<2x128xf32>
    %24 = arith.addf %19, %23 : vector<2x128xf32>
    %25 = vector.shape_cast %18 : vector<2x128xf32> to vector<2x1x128xf32>
    %26 = vector.broadcast %25 : vector<2x1x128xf32> to vector<2x8x128xf32>
    %27 = arith.addf %26, %8 : vector<2x8x128xf32>
    %28 = math.tanh %27 : vector<2x8x128xf32>
    %29 = vector.shape_cast %28 : vector<2x8x128xf32> to vector<16x128xf32>
    %30 = vector.shape_cast %24 : vector<2x128xf32> to vector<2x1x128xf32>
    %31 = vector.broadcast %30 : vector<2x1x128xf32> to vector<2x8x128xf32>
    %32 = arith.addf %31, %10 : vector<2x8x128xf32>
    %33 = math.tanh %32 : vector<2x8x128xf32>
    %34 = vector.shape_cast %33 : vector<2x8x128xf32> to vector<16x128xf32>
    %35 = arith.truncf %29 : vector<16x128xf32> to vector<16x128xbf16>
    %36 = arith.truncf %34 : vector<16x128xf32> to vector<16x128xbf16>
    %37 = vector.extract_strided_slice %1 {offsets = [0, 256], sizes = [128, 128], strides = [1, 1]} : vector<128x1024xbf16> to vector<128x128xbf16>
    %cst_17 = arith.constant dense<0.000000e+00> : vector<16x128xf32>
    %38 = tpu.matmul %35, %37, %cst_17 {dimension_numbers = #tpu.dot_dimension_numbers<[1], [0], [0], [1], [0, 0, 1, 1], [], []>} : vector<16x128xbf16>, vector<128x128xbf16>, vector<16x128xf32> -> vector<16x128xf32>
    %39 = vector.extract_strided_slice %3 {offsets = [2, 0], sizes = [1, 128], strides = [1, 1]} : vector<12x128xf32> to vector<1x128xf32>
    %40 = vector.shape_cast %39 : vector<1x128xf32> to vector<128xf32>
    %41 = vector.shape_cast %40 : vector<128xf32> to vector<1x128xf32>
    %42 = vector.broadcast %41 : vector<1x128xf32> to vector<16x128xf32>
    %43 = arith.addf %38, %42 : vector<16x128xf32>
    %44 = vector.extract_strided_slice %1 {offsets = [0, 384], sizes = [128, 256], strides = [1, 1]} : vector<128x1024xbf16> to vector<128x256xbf16>
    %cst_18 = arith.constant dense<0.000000e+00> : vector<16x256xf32>
    %45 = tpu.matmul %36, %44, %cst_18 {dimension_numbers = #tpu.dot_dimension_numbers<[1], [0], [0], [1], [0, 0, 1, 1], [], []>} : vector<16x128xbf16>, vector<128x256xbf16>, vector<16x256xf32> -> vector<16x256xf32>
    %46 = vector.extract_strided_slice %45 {offsets = [0, 0], sizes = [16, 128], strides = [1, 1]} : vector<16x256xf32> to vector<16x128xf32>
    %47 = vector.extract_strided_slice %3 {offsets = [3, 0], sizes = [1, 128], strides = [1, 1]} : vector<12x128xf32> to vector<1x128xf32>
    %48 = vector.shape_cast %47 : vector<1x128xf32> to vector<128xf32>
    %49 = vector.shape_cast %48 : vector<128xf32> to vector<1x128xf32>
    %50 = vector.broadcast %49 : vector<1x128xf32> to vector<16x128xf32>
    %51 = arith.addf %46, %50 : vector<16x128xf32>
    %52 = vector.extract_strided_slice %45 {offsets = [0, 128], sizes = [16, 128], strides = [1, 1]} : vector<16x256xf32> to vector<16x128xf32>
    %53 = vector.extract_strided_slice %3 {offsets = [4, 0], sizes = [1, 128], strides = [1, 1]} : vector<12x128xf32> to vector<1x128xf32>
    %54 = vector.shape_cast %53 : vector<1x128xf32> to vector<128xf32>
    %55 = vector.shape_cast %54 : vector<128xf32> to vector<1x128xf32>
    %56 = vector.broadcast %55 : vector<1x128xf32> to vector<16x128xf32>
    %57 = arith.addf %52, %56 : vector<16x128xf32>
    %58 = arith.truncf %43 : vector<16x128xf32> to vector<16x128xbf16>
    %59 = arith.truncf %51 : vector<16x128xf32> to vector<16x128xbf16>
    %60 = arith.truncf %57 : vector<16x128xf32> to vector<16x128xbf16>
    %61 = vector.extract_strided_slice %58 {offsets = [0, 0], sizes = [16, 32], strides = [1, 1]} : vector<16x128xbf16> to vector<16x32xbf16>
    %62 = vector.extract_strided_slice %59 {offsets = [0, 0], sizes = [16, 32], strides = [1, 1]} : vector<16x128xbf16> to vector<16x32xbf16>
    %cst_19 = arith.constant dense<0.000000e+00> : vector<16x16xf32>
    %63 = tpu.matmul %61, %62, %cst_19 {dimension_numbers = #tpu.dot_dimension_numbers<[1], [1], [0], [0], [0, 0, 1, 0], [], []>} : vector<16x32xbf16>, vector<16x32xbf16>, vector<16x16xf32> -> vector<16x16xf32>
    %64 = arith.addf %63, %4 : vector<16x16xf32>
    %cst_20 = arith.constant dense<0xFF800000> : vector<16xf32>
    %65 = vector.multi_reduction <maximumf>, %64, %cst_20 [1] : vector<16x16xf32> to vector<16xf32>
    %66 = vector.shape_cast %65 : vector<16xf32> to vector<16x1xf32>
    %67 = vector.broadcast %66 : vector<16x1xf32> to vector<16x16xf32>
    %68 = arith.subf %64, %67 : vector<16x16xf32>
    %69 = math.exp %68 : vector<16x16xf32>
    %cst_21 = arith.constant dense<0.000000e+00> : vector<16xf32>
    %70 = vector.multi_reduction <add>, %69, %cst_21 [1] : vector<16x16xf32> to vector<16xf32>
    %71 = vector.shape_cast %70 : vector<16xf32> to vector<16x1xf32>
    %72 = tpu.reciprocal %71 {approx = true} : vector<16x1xf32> -> vector<16x1xf32>
    %73 = vector.broadcast %72 : vector<16x1xf32> to vector<16x16xf32>
    %74 = arith.mulf %69, %73 : vector<16x16xf32>
    %75 = arith.truncf %74 : vector<16x16xf32> to vector<16x16xbf16>
    %76 = vector.extract_strided_slice %60 {offsets = [0, 0], sizes = [16, 32], strides = [1, 1]} : vector<16x128xbf16> to vector<16x32xbf16>
    %cst_22 = arith.constant dense<0.000000e+00> : vector<16x32xf32>
    %77 = tpu.matmul %75, %76, %cst_22 {dimension_numbers = #tpu.dot_dimension_numbers<[1], [0], [0], [1], [0, 0, 1, 1], [], []>} : vector<16x16xbf16>, vector<16x32xbf16>, vector<16x32xf32> -> vector<16x32xf32>
    %78 = vector.extract_strided_slice %58 {offsets = [0, 32], sizes = [16, 32], strides = [1, 1]} : vector<16x128xbf16> to vector<16x32xbf16>
    %79 = vector.extract_strided_slice %59 {offsets = [0, 32], sizes = [16, 32], strides = [1, 1]} : vector<16x128xbf16> to vector<16x32xbf16>
    %cst_23 = arith.constant dense<0.000000e+00> : vector<16x16xf32>
    %80 = tpu.matmul %78, %79, %cst_23 {dimension_numbers = #tpu.dot_dimension_numbers<[1], [1], [0], [0], [0, 0, 1, 0], [], []>} : vector<16x32xbf16>, vector<16x32xbf16>, vector<16x16xf32> -> vector<16x16xf32>
    %81 = arith.addf %80, %4 : vector<16x16xf32>
    %cst_24 = arith.constant dense<0xFF800000> : vector<16xf32>
    %82 = vector.multi_reduction <maximumf>, %81, %cst_24 [1] : vector<16x16xf32> to vector<16xf32>
    %83 = vector.shape_cast %82 : vector<16xf32> to vector<16x1xf32>
    %84 = vector.broadcast %83 : vector<16x1xf32> to vector<16x16xf32>
    %85 = arith.subf %81, %84 : vector<16x16xf32>
    %86 = math.exp %85 : vector<16x16xf32>
    %cst_25 = arith.constant dense<0.000000e+00> : vector<16xf32>
    %87 = vector.multi_reduction <add>, %86, %cst_25 [1] : vector<16x16xf32> to vector<16xf32>
    %88 = vector.shape_cast %87 : vector<16xf32> to vector<16x1xf32>
    %89 = tpu.reciprocal %88 {approx = true} : vector<16x1xf32> -> vector<16x1xf32>
    %90 = vector.broadcast %89 : vector<16x1xf32> to vector<16x16xf32>
    %91 = arith.mulf %86, %90 : vector<16x16xf32>
    %92 = arith.truncf %91 : vector<16x16xf32> to vector<16x16xbf16>
    %93 = vector.extract_strided_slice %60 {offsets = [0, 32], sizes = [16, 32], strides = [1, 1]} : vector<16x128xbf16> to vector<16x32xbf16>
    %cst_26 = arith.constant dense<0.000000e+00> : vector<16x32xf32>
    %94 = tpu.matmul %92, %93, %cst_26 {dimension_numbers = #tpu.dot_dimension_numbers<[1], [0], [0], [1], [0, 0, 1, 1], [], []>} : vector<16x16xbf16>, vector<16x32xbf16>, vector<16x32xf32> -> vector<16x32xf32>
    %95 = vector.extract_strided_slice %58 {offsets = [0, 64], sizes = [16, 32], strides = [1, 1]} : vector<16x128xbf16> to vector<16x32xbf16>
    %96 = vector.extract_strided_slice %59 {offsets = [0, 64], sizes = [16, 32], strides = [1, 1]} : vector<16x128xbf16> to vector<16x32xbf16>
    %cst_27 = arith.constant dense<0.000000e+00> : vector<16x16xf32>
    %97 = tpu.matmul %95, %96, %cst_27 {dimension_numbers = #tpu.dot_dimension_numbers<[1], [1], [0], [0], [0, 0, 1, 0], [], []>} : vector<16x32xbf16>, vector<16x32xbf16>, vector<16x16xf32> -> vector<16x16xf32>
    %98 = arith.addf %97, %4 : vector<16x16xf32>
    %cst_28 = arith.constant dense<0xFF800000> : vector<16xf32>
    %99 = vector.multi_reduction <maximumf>, %98, %cst_28 [1] : vector<16x16xf32> to vector<16xf32>
    %100 = vector.shape_cast %99 : vector<16xf32> to vector<16x1xf32>
    %101 = vector.broadcast %100 : vector<16x1xf32> to vector<16x16xf32>
    %102 = arith.subf %98, %101 : vector<16x16xf32>
    %103 = math.exp %102 : vector<16x16xf32>
    %cst_29 = arith.constant dense<0.000000e+00> : vector<16xf32>
    %104 = vector.multi_reduction <add>, %103, %cst_29 [1] : vector<16x16xf32> to vector<16xf32>
    %105 = vector.shape_cast %104 : vector<16xf32> to vector<16x1xf32>
    %106 = tpu.reciprocal %105 {approx = true} : vector<16x1xf32> -> vector<16x1xf32>
    %107 = vector.broadcast %106 : vector<16x1xf32> to vector<16x16xf32>
    %108 = arith.mulf %103, %107 : vector<16x16xf32>
    %109 = arith.truncf %108 : vector<16x16xf32> to vector<16x16xbf16>
    %110 = vector.extract_strided_slice %60 {offsets = [0, 64], sizes = [16, 32], strides = [1, 1]} : vector<16x128xbf16> to vector<16x32xbf16>
    %cst_30 = arith.constant dense<0.000000e+00> : vector<16x32xf32>
    %111 = tpu.matmul %109, %110, %cst_30 {dimension_numbers = #tpu.dot_dimension_numbers<[1], [0], [0], [1], [0, 0, 1, 1], [], []>} : vector<16x16xbf16>, vector<16x32xbf16>, vector<16x32xf32> -> vector<16x32xf32>
    %112 = vector.extract_strided_slice %58 {offsets = [0, 96], sizes = [16, 32], strides = [1, 1]} : vector<16x128xbf16> to vector<16x32xbf16>
    %113 = vector.extract_strided_slice %59 {offsets = [0, 96], sizes = [16, 32], strides = [1, 1]} : vector<16x128xbf16> to vector<16x32xbf16>
    %cst_31 = arith.constant dense<0.000000e+00> : vector<16x16xf32>
    %114 = tpu.matmul %112, %113, %cst_31 {dimension_numbers = #tpu.dot_dimension_numbers<[1], [1], [0], [0], [0, 0, 1, 0], [], []>} : vector<16x32xbf16>, vector<16x32xbf16>, vector<16x16xf32> -> vector<16x16xf32>
    %115 = arith.addf %114, %4 : vector<16x16xf32>
    %cst_32 = arith.constant dense<0xFF800000> : vector<16xf32>
    %116 = vector.multi_reduction <maximumf>, %115, %cst_32 [1] : vector<16x16xf32> to vector<16xf32>
    %117 = vector.shape_cast %116 : vector<16xf32> to vector<16x1xf32>
    %118 = vector.broadcast %117 : vector<16x1xf32> to vector<16x16xf32>
    %119 = arith.subf %115, %118 : vector<16x16xf32>
    %120 = math.exp %119 : vector<16x16xf32>
    %cst_33 = arith.constant dense<0.000000e+00> : vector<16xf32>
    %121 = vector.multi_reduction <add>, %120, %cst_33 [1] : vector<16x16xf32> to vector<16xf32>
    %122 = vector.shape_cast %121 : vector<16xf32> to vector<16x1xf32>
    %123 = tpu.reciprocal %122 {approx = true} : vector<16x1xf32> -> vector<16x1xf32>
    %124 = vector.broadcast %123 : vector<16x1xf32> to vector<16x16xf32>
    %125 = arith.mulf %120, %124 : vector<16x16xf32>
    %126 = arith.truncf %125 : vector<16x16xf32> to vector<16x16xbf16>
    %127 = vector.extract_strided_slice %60 {offsets = [0, 96], sizes = [16, 32], strides = [1, 1]} : vector<16x128xbf16> to vector<16x32xbf16>
    %cst_34 = arith.constant dense<0.000000e+00> : vector<16x32xf32>
    %128 = tpu.matmul %126, %127, %cst_34 {dimension_numbers = #tpu.dot_dimension_numbers<[1], [0], [0], [1], [0, 0, 1, 1], [], []>} : vector<16x16xbf16>, vector<16x32xbf16>, vector<16x32xf32> -> vector<16x32xf32>
    %129 = tpu.concatenate %77, %94, %111, %128 in 1 : vector<16x32xf32>, vector<16x32xf32>, vector<16x32xf32>, vector<16x32xf32> -> vector<16x128xf32>
    %130 = arith.truncf %129 : vector<16x128xf32> to vector<16x128xbf16>
    %131 = vector.extract_strided_slice %1 {offsets = [0, 640], sizes = [128, 128], strides = [1, 1]} : vector<128x1024xbf16> to vector<128x128xbf16>
    %cst_35 = arith.constant dense<0.000000e+00> : vector<16x128xf32>
    %132 = tpu.matmul %130, %131, %cst_35 {dimension_numbers = #tpu.dot_dimension_numbers<[1], [0], [0], [1], [0, 0, 1, 1], [], []>} : vector<16x128xbf16>, vector<128x128xbf16>, vector<16x128xf32> -> vector<16x128xf32>
    %133 = vector.extract_strided_slice %3 {offsets = [5, 0], sizes = [1, 128], strides = [1, 1]} : vector<12x128xf32> to vector<1x128xf32>
    %134 = vector.shape_cast %133 : vector<1x128xf32> to vector<128xf32>
    %135 = vector.shape_cast %134 : vector<128xf32> to vector<1x128xf32>
    %136 = vector.broadcast %135 : vector<1x128xf32> to vector<16x128xf32>
    %137 = arith.addf %132, %136 : vector<16x128xf32>
    %138 = arith.addf %29, %137 : vector<16x128xf32>
    %139 = vector.extract_strided_slice %3 {offsets = [6, 0], sizes = [1, 128], strides = [1, 1]} : vector<12x128xf32> to vector<1x128xf32>
    %140 = vector.shape_cast %139 : vector<1x128xf32> to vector<128xf32>
    %141 = vector.extract_strided_slice %3 {offsets = [7, 0], sizes = [1, 128], strides = [1, 1]} : vector<12x128xf32> to vector<1x128xf32>
    %142 = vector.shape_cast %141 : vector<1x128xf32> to vector<128xf32>
    %cst_36 = arith.constant dense<0.000000e+00> : vector<16xf32>
    %143 = vector.multi_reduction <add>, %138, %cst_36 [1] : vector<16x128xf32> to vector<16xf32>
    %144 = vector.shape_cast %143 : vector<16xf32> to vector<16x1xf32>
    %cst_37 = arith.constant 1.280000e+02 : f32
    %145 = vector.broadcast %cst_37 : f32 to vector<16x1xf32>
    %146 = arith.divf %144, %145 : vector<16x1xf32>
    %147 = vector.broadcast %146 : vector<16x1xf32> to vector<16x128xf32>
    %148 = arith.subf %138, %147 : vector<16x128xf32>
    %149 = arith.mulf %148, %148 : vector<16x128xf32>
    %cst_38 = arith.constant dense<0.000000e+00> : vector<16xf32>
    %150 = vector.multi_reduction <add>, %149, %cst_38 [1] : vector<16x128xf32> to vector<16xf32>
    %151 = vector.shape_cast %150 : vector<16xf32> to vector<16x1xf32>
    %cst_39 = arith.constant 1.280000e+02 : f32
    %152 = vector.broadcast %cst_39 : f32 to vector<16x1xf32>
    %153 = arith.divf %151, %152 : vector<16x1xf32>
    %154 = vector.broadcast %146 : vector<16x1xf32> to vector<16x128xf32>
    %155 = arith.subf %138, %154 : vector<16x128xf32>
    %cst_40 = arith.constant 9.99999974E-6 : f32
    %156 = vector.broadcast %cst_40 : f32 to vector<16x1xf32>
    %157 = arith.addf %153, %156 : vector<16x1xf32>
    %158 = math.rsqrt %157 : vector<16x1xf32>
    %159 = vector.broadcast %158 : vector<16x1xf32> to vector<16x128xf32>
    %160 = arith.mulf %155, %159 : vector<16x128xf32>
    %161 = vector.shape_cast %140 : vector<128xf32> to vector<1x128xf32>
    %162 = vector.broadcast %161 : vector<1x128xf32> to vector<16x128xf32>
    %163 = arith.mulf %160, %162 : vector<16x128xf32>
    %164 = vector.shape_cast %142 : vector<128xf32> to vector<1x128xf32>
    %165 = vector.broadcast %164 : vector<1x128xf32> to vector<16x128xf32>
    %166 = arith.addf %163, %165 : vector<16x128xf32>
    %167 = arith.truncf %166 : vector<16x128xf32> to vector<16x128xbf16>
    %168 = vector.extract_strided_slice %1 {offsets = [0, 768], sizes = [128, 128], strides = [1, 1]} : vector<128x1024xbf16> to vector<128x128xbf16>
    %cst_41 = arith.constant dense<0.000000e+00> : vector<16x128xf32>
    %169 = tpu.matmul %167, %168, %cst_41 {dimension_numbers = #tpu.dot_dimension_numbers<[1], [0], [0], [1], [0, 0, 1, 1], [], []>} : vector<16x128xbf16>, vector<128x128xbf16>, vector<16x128xf32> -> vector<16x128xf32>
    %170 = vector.extract_strided_slice %3 {offsets = [8, 0], sizes = [1, 128], strides = [1, 1]} : vector<12x128xf32> to vector<1x128xf32>
    %171 = vector.shape_cast %170 : vector<1x128xf32> to vector<128xf32>
    %172 = vector.shape_cast %171 : vector<128xf32> to vector<1x128xf32>
    %173 = vector.broadcast %172 : vector<1x128xf32> to vector<16x128xf32>
    %174 = arith.addf %169, %173 : vector<16x128xf32>
    %cst_42 = arith.constant 0.000000e+00 : f32
    %175 = vector.broadcast %cst_42 : f32 to vector<16x128xf32>
    %176 = arith.maximumf %174, %175 : vector<16x128xf32>
    %177 = arith.truncf %176 : vector<16x128xf32> to vector<16x128xbf16>
    %178 = vector.extract_strided_slice %1 {offsets = [0, 896], sizes = [128, 128], strides = [1, 1]} : vector<128x1024xbf16> to vector<128x128xbf16>
    %cst_43 = arith.constant dense<0.000000e+00> : vector<16x128xf32>
    %179 = tpu.matmul %177, %178, %cst_43 {dimension_numbers = #tpu.dot_dimension_numbers<[1], [0], [0], [1], [0, 0, 1, 1], [], []>} : vector<16x128xbf16>, vector<128x128xbf16>, vector<16x128xf32> -> vector<16x128xf32>
    %180 = vector.extract_strided_slice %3 {offsets = [9, 0], sizes = [1, 128], strides = [1, 1]} : vector<12x128xf32> to vector<1x128xf32>
    %181 = vector.shape_cast %180 : vector<1x128xf32> to vector<128xf32>
    %182 = vector.shape_cast %181 : vector<128xf32> to vector<1x128xf32>
    %183 = vector.broadcast %182 : vector<1x128xf32> to vector<16x128xf32>
    %184 = arith.addf %179, %183 : vector<16x128xf32>
    %185 = arith.addf %166, %184 : vector<16x128xf32>
    %186 = vector.extract_strided_slice %3 {offsets = [10, 0], sizes = [1, 128], strides = [1, 1]} : vector<12x128xf32> to vector<1x128xf32>
    %187 = vector.shape_cast %186 : vector<1x128xf32> to vector<128xf32>
    %188 = vector.extract_strided_slice %3 {offsets = [11, 0], sizes = [1, 128], strides = [1, 1]} : vector<12x128xf32> to vector<1x128xf32>
    %189 = vector.shape_cast %188 : vector<1x128xf32> to vector<128xf32>
    %cst_44 = arith.constant dense<0.000000e+00> : vector<16xf32>
    %190 = vector.multi_reduction <add>, %185, %cst_44 [1] : vector<16x128xf32> to vector<16xf32>
    %191 = vector.shape_cast %190 : vector<16xf32> to vector<16x1xf32>
    %cst_45 = arith.constant 1.280000e+02 : f32
    %192 = vector.broadcast %cst_45 : f32 to vector<16x1xf32>
    %193 = arith.divf %191, %192 : vector<16x1xf32>
    %194 = vector.broadcast %193 : vector<16x1xf32> to vector<16x128xf32>
    %195 = arith.subf %185, %194 : vector<16x128xf32>
    %196 = arith.mulf %195, %195 : vector<16x128xf32>
    %cst_46 = arith.constant dense<0.000000e+00> : vector<16xf32>
    %197 = vector.multi_reduction <add>, %196, %cst_46 [1] : vector<16x128xf32> to vector<16xf32>
    %198 = vector.shape_cast %197 : vector<16xf32> to vector<16x1xf32>
    %cst_47 = arith.constant 1.280000e+02 : f32
    %199 = vector.broadcast %cst_47 : f32 to vector<16x1xf32>
    %200 = arith.divf %198, %199 : vector<16x1xf32>
    %201 = vector.broadcast %193 : vector<16x1xf32> to vector<16x128xf32>
    %202 = arith.subf %185, %201 : vector<16x128xf32>
    %cst_48 = arith.constant 9.99999974E-6 : f32
    %203 = vector.broadcast %cst_48 : f32 to vector<16x1xf32>
    %204 = arith.addf %200, %203 : vector<16x1xf32>
    %205 = math.rsqrt %204 : vector<16x1xf32>
    %206 = vector.broadcast %205 : vector<16x1xf32> to vector<16x128xf32>
    %207 = arith.mulf %202, %206 : vector<16x128xf32>
    %208 = vector.shape_cast %187 : vector<128xf32> to vector<1x128xf32>
    %209 = vector.broadcast %208 : vector<1x128xf32> to vector<16x128xf32>
    %210 = arith.mulf %207, %209 : vector<16x128xf32>
    %211 = vector.shape_cast %189 : vector<128xf32> to vector<1x128xf32>
    %212 = vector.broadcast %211 : vector<1x128xf32> to vector<16x128xf32>
    %213 = arith.addf %210, %212 : vector<16x128xf32>
    %214 = vector.shape_cast %8 : vector<2x8x128xf32> to vector<16x128xf32>
    %215 = arith.addf %214, %213 : vector<16x128xf32>
    %216 = arith.mulf %215, %215 : vector<16x128xf32>
    %cst_49 = arith.constant dense<0.000000e+00> : vector<16xf32>
    %217 = vector.multi_reduction <add>, %216, %cst_49 [1] : vector<16x128xf32> to vector<16xf32>
    %218 = vector.shape_cast %217 : vector<16xf32> to vector<16x1xf32>
    %cst_50 = arith.constant 1.000000e-24 : f32
    %219 = vector.broadcast %cst_50 : f32 to vector<16x1xf32>
    %220 = arith.maximumf %218, %219 : vector<16x1xf32>
    %221 = math.rsqrt %220 : vector<16x1xf32>
    %222 = vector.broadcast %221 : vector<16x1xf32> to vector<16x128xf32>
    %223 = arith.mulf %215, %222 : vector<16x128xf32>
    %224 = vector.shape_cast %223 : vector<16x128xf32> to vector<2x8x128xf32>
    %c0_51 = arith.constant 0 : index
    %c0_52 = arith.constant 0 : index
    %c0_53 = arith.constant 0 : index
    %c0_54 = arith.constant 0 : index
    %225 = vector.load %arg7[%c0_51, %c0_52, %c0_53, %c0_54] : memref<1x2x8x128xf32, #tpu.memory_space<vmem>>, vector<1x2x8x128xf32>
    %226 = vector.shape_cast %225 : vector<1x2x8x128xf32> to vector<2x8x128xf32>
    %227 = vector.shape_cast %224 : vector<2x8x128xf32> to vector<1x2x8x128xf32>
    tpu.vector_store %arg7[%c0_51, %c0_52, %c0_53, %c0_54], %227 {strides = array<i32>} : memref<1x2x8x128xf32, #tpu.memory_space<vmem>>, vector<1x2x8x128xf32>,
    return
  }
  func.func @transform_0(%arg0: i32) -> (i32, i32, i32, i32) {
    %c0_i32 = arith.constant 0 : i32
    %c0_i32_0 = arith.constant 0 : i32
    %c0_i32_1 = arith.constant 0 : i32
    %c0_i32_2 = arith.constant 0 : i32
    return %arg0, %c0_i32, %c0_i32_0, %c0_i32_1 : i32, i32, i32, i32
  }
  func.func @transform_1(%arg0: i32) -> (i32, i32, i32, i32) {
    %c0_i32 = arith.constant 0 : i32
    %c0_i32_0 = arith.constant 0 : i32
    %c0_i32_1 = arith.constant 0 : i32
    %c0_i32_2 = arith.constant 0 : i32
    return %arg0, %c0_i32, %c0_i32_0, %c0_i32_1 : i32, i32, i32, i32
  }
  func.func @transform_2(%arg0: i32) -> (i32, i32) {
    %c0_i32 = arith.constant 0 : i32
    %c0_i32_0 = arith.constant 0 : i32
    %c0_i32_1 = arith.constant 0 : i32
    return %c0_i32, %c0_i32_0 : i32, i32
  }
  func.func @transform_3(%arg0: i32) -> (i32, i32) {
    %c0_i32 = arith.constant 0 : i32
    %c0_i32_0 = arith.constant 0 : i32
    %c0_i32_1 = arith.constant 0 : i32
    return %c0_i32, %c0_i32_0 : i32, i32
  }
  func.func @transform_4(%arg0: i32) -> (i32, i32, i32) {
    %c0_i32 = arith.constant 0 : i32
    %c0_i32_0 = arith.constant 0 : i32
    %c0_i32_1 = arith.constant 0 : i32
    return %arg0, %c0_i32, %c0_i32_0 : i32, i32, i32
  }
  func.func @transform_5(%arg0: i32) -> (i32, i32, i32) {
    %c0_i32 = arith.constant 0 : i32
    %c0_i32_0 = arith.constant 0 : i32
    %c0_i32_1 = arith.constant 0 : i32
    return %arg0, %c0_i32, %c0_i32_0 : i32, i32, i32
  }
  func.func @transform_6(%arg0: i32) -> (i32, i32, i32, i32) {
    %c0_i32 = arith.constant 0 : i32
    %c0_i32_0 = arith.constant 0 : i32
    %c0_i32_1 = arith.constant 0 : i32
    %c0_i32_2 = arith.constant 0 : i32
    return %arg0, %c0_i32, %c0_i32_0, %c0_i32_1 : i32, i32, i32, i32
  }
}

</mosaic_0001>

<bundles_post_ra>
// kernel: gat_qgc_layer_forward.1
= control target key start
LH: loop header
LB: loop body
LE: loop exit
PB: predicated region body
PF: predicated region fallthrough
CT: control target
= control target key end

     0   :  { %11 = vsyncpa [#allocation3], 0  ;;  %s2805_s0 = inlined_call_operand.vmem [shape: f32[2,2,8,128], index: 0, kind: input, shape index: {}]   ;;  %s2806_s1 = inlined_call_operand.vmem [shape: f32[2,2,8,128], index: 1, kind: input, shape index: {}]   ;;  %s2807_s2 = inlined_call_operand.vmem [shape: f32[2,128], index: 2, kind: input, shape index: {}]   ;;  %s2808_s3 = inlined_call_operand.vmem [shape: f32[16,16], index: 3, kind: input, shape index: {}]   ;;  %s2809_s4 = inlined_call_operand.hbm [shape: bf16[2,128,1024], index: 4, kind: input, shape index: {}]   ;;  %s2810_s5 = inlined_call_operand.vmem [shape: f32[2,12,128], index: 5, kind: input, shape index: {}]   ;;  %s2811_s6 = inlined_call_operand.vmem [shape: f32[2,2,8,128], index: 6, kind: output, shape index: {}]  }
   0x1   :  { %13 = vsyncpa [#allocation3 + $0x1], 0  ;;  %s2302_s21 = smov 0   ;;  %s2304_s22 = smov 0  }
   0x2   :  { %s2306_s23 = smov 0   ;;  %s2308_s24 = smov 0  }
   0x3 LB: > { %s2321_s25 = sadd.s32 4294967295, %s2255_s24   ;;  %s2324_s26 = sadd.s32 1, %s2255_s24   ;;  %s2255_s24 = sphi %s2308_s24, %s2820_s24   ;;  %s2251_s23 = sphi %s2306_s23, %s2819_s23   ;;  %s2247_s22 = sphi %s2304_s22, %s2818_s22   ;;  %s2243_s21 = sphi %s2302_s21, %s2817_s21  }
   0x4   : > { %s117_s27 = ssub.s32 %s2255_s24, %s2324_s26  ;;  %s120_s28 = sadd.s32 1, %s2251_s23 }
   0x5   : > { %p118_p0 = scmp.eq.s32.totalorder %s117_s27, 0  ;;  %p127_p1 = scmp.ne.s32.totalorder %s2251_s23, %s2247_s22 }
   0x6   : > { %p128_p2 = scmp.eq.s32.totalorder %s2255_s24, 0  ;;  %p133_p3 = scmp.ne.s32.totalorder %s2247_s22, %s2243_s21 }
   0x7   : > { %s2334_s29 = scalar_select %p118_p0, %s2251_s23, %s120_s28  }
   0x8   : > { %p129_p4 = por %p128_p2, %p127_p1  ;;  %p134_p5 = scmp.eq.s32.totalorder %s2321_s25, 0 }
   0x9   : > { %p2084_p6 = scmp.lt.s32.totalorder %s2255_s24, 2  ;;  %s231_s7 = sand.u32 1, %s2251_s23  }
   0xa   : > { %p2338_p7 = por %p134_p5, %p133_p3  ;;  %s1806_s8 = sshll.u32 %s231_s7, 9 }
   0xb   : > { %s1893_s9 = sshll.u32 %s2255_s24, 13  ;;  %s235_s13 = scalar_lea.vmem [#allocation2], %s1806_s8 }
   0xc   : > { %s2813_s30 = scalar_select %p2338_p7, 1, 0 }
   0xd   : > { %s2347_s12 = scalar_lea.hbm %s2809_s4, %s1893_s9  ;;  %s242_s14 = sshll.u32 %s235_s13, 4  ;;  %s2349_s14 = int_to_ptr.vmem [resolvable:$true] %s242_s14 }
   0xe   : > { %p2351_p8 = pnand %p2084_p6, %p129_p4  ;;  %s2356_s16 = scalar_lea.sflag [#allocation3], %s231_s7 }
   0xf   : > { %s2193_s17 = scalar_lea.hbm %s2347_s12, 8192  ;;  %s2198_s20 = scalar_lea.hbm %s2809_s4, 16384 }
  0x10   : > { %p2194_p10 = scmp.ne.s32.totalorder %s2347_s12, %s2193_s17  ;;  %p2195_p11 = pneg %p2351_p8 }
  0x11   : > { %p2199_p0 = scmp.lt.s32.totalorder %s2347_s12, %s2809_s4  ;;  %p2200_p1 = scmp.lt.s32.totalorder %s2198_s20, %s2193_s17 }
  0x12   : > { %p2196_p12 = pnand %p2195_p11, %p2194_p10 }
  0x13   : > { %p2201_p2 = por %p2200_p1, %p2199_p0 }
  0x14   : > { %p2197_p13 = pneg %p2196_p12 }
  0x16   : > { %p2202_p3 = pnand %p2201_p2, %p2197_p13 }
  0x18   : > { %2205 = shalt.err (!%p2202_p3)
}
  0x19   : > { %s2206_s28 = scalar_lea.vmem %s2349_s14, 8192  ;;  %s2257_s7 = smov [#allocation2]  }
  0x1a   : > { %p2207_p4 = scmp.ne.s32.totalorder %s2349_s14, %s2206_s28  ;;  %s2211_s8 = sshll.u32 %s2257_s7, 4  ;;  %s2212_s8 = int_to_ptr.vmem [resolvable:$false] %s2211_s8 }
  0x1b   : > { %s2213_s9 = scalar_lea.vmem %s2212_s8, 16384  ;;  %p2214_p10 = scmp.lt.s32.totalorder %s2349_s14, %s2212_s8 }
  0x1c   : > { %p2209_p5 = pnand %p2207_p4, %p2195_p11  ;;  %p2215_p12 = scmp.lt.s32.totalorder %s2213_s9, %s2206_s28 }
  0x1e   : > { %p2210_p6 = pneg %p2209_p5  ;;  %p2216_p9 = por %p2215_p12, %p2214_p10 }
  0x20   : > { %p2217_p7 = pnand %p2216_p9, %p2210_p6 }
  0x22   : > { %2220 = shalt.err (!%p2217_p7)
}
  0x23   : > { %s2258_s10 = smov 512   ;;  %s2259_s11 = smov 32  }
  0x24   : > { %2083 = dma.hbm_to_vmem [thread:$0]  (!%p2351_p8), %s2347_s12, 8192, %s2349_s14, %s2356_s16, %s2258_s10, %s2258_s10, %s2259_s11  }
  0x25   : > { %p258_p11 = scmp.lt.s32.totalorder %s2255_s24, 3  ;;  %p2815_p13 = scmp.ge.s32.totalorder %s2255_s24, 1 }
  0x27   : > { %p259_p0 = pnand %p2815_p13, %p258_p11 }
  0x28   : > { %s264_s13 = sand.u32 (!%p259_p0), 1, %s2247_s22   ;;  %p2816_p7 = scmp.ne.s32.totalorder (!%p259_p0), %s2813_s30, 0 }
  0x29   : > { %262 = sbr.rel (%p259_p0) target bundleno = 4290 (0x10c2), region = 44  ;;  %s1810_s17 = sshll.u32 (!%p259_p0), %s264_s13, 9 }
  0x2a   : > { %s265_s18 = scalar_lea.sflag (!%p259_p0), [#allocation3], %s264_s13  ;;  %s2381_s19 = scalar_lea.vmem (!%p259_p0), [#allocation2], %s1810_s17 }
  0x2e   : > { %2238 = dma.done.wait (%p2816_p7), %s265_s18, 8192  }
  0x2f   : > { %2240 = vsyncadd (%p2816_p7), %s265_s18, 4294959104  ;;  %v2260_v0 = vmov 0   ;;  %v2261_v1 = vmov 0.0   ;;  %v389_v2 = vld [vmem:[%s2381_s19 + $0x1c0] sm:$0xff]  ;;  %v390_v15 = vld [vmem:[%s2381_s19 + $0x1c8] sm:$0xff]  ;;  %vm2262_vm0 = vmmov 0  }
  0x30   : > { %519 = vmatprep.mubr.bf16.mxu0 %v2260_v0  ;;  %1950 = vmatprep.subr.bf16.mxu1 %v2261_v1  ;;  %v393_v3 = vld [vmem:[%s2381_s19 + $0x1e0] sm:$0xff]  ;;  %v394_v16 = vld [vmem:[%s2381_s19 + $0x1e8] sm:$0xff]  ;;  %v2400_v17 = vld [vmem:[%s2381_s19 + $0x1d0] sm:$0xff]  ;;  %p312_p8 = scmp.lt.s32.totalorder %s2321_s25, 1  ;;  %vm845_vm1 = vcmask 261120   ;;  %vm893_vm2 = vcmask 130048  }
  0x31   : > { %v381_v4 = vld [vmem:[%s2381_s19 + $0x180] sm:$0xff]  ;;  %v1834_v5 = vcombine.high %v389_v2, %v393_v3  ;;  %v1833_v6 = vcombine.low %v389_v2, %v393_v3  ;;  %v2403_v18 = vld [vmem:[%s2381_s19 + $0x1f0] sm:$0xff]  ;;  %v1842_v19 = vcombine.low %v390_v15, %v394_v16  ;;  %v1857_v43 = vcombine.high %v390_v15, %v394_v16  ;;  %v382_v44 = vld [vmem:[%s2381_s19 + $0x188] sm:$0xff]  ;;  %1966 = vmatprep.mubr.msk.bf16.mxu1 %vm2262_vm0, %v2261_v1  ;;  %s2264_s13 = smov 96   ;;  %s2265_s17 = smov 64  }
  0x32   : > { %v385_v7 = vld [vmem:[%s2381_s19 + $0x1a0] sm:$0xff]  ;;  %v1874_v20 = vcombine.high %v2400_v17, %v2403_v18  ;;  %v1858_v41 = vcombine.low %v2400_v17, %v2403_v18  ;;  %v386_v45 = vld [vmem:[%s2381_s19 + $0x1a8] sm:$0xff]  ;;  %v2425_v47 = vld [vmem:[%s2381_s19 + $0x190] sm:$0xff]  ;;  %s2822_s25 = smov (!%p312_p8, %s2321_s25), 1  ;;  %s2266_s18 = smov 32   ;;  %vm1353_vm3 = vcmask 523264  }
  0x33   : > { %v1832_v8 = vcombine.high %v381_v4, %v385_v7  ;;  %v373_v9 = vld [vmem:[%s2381_s19 + $0x140] sm:$0xff]  ;;  %487 = vmatprep.subr.bf16.mxu0 %v1834_v5  ;;  %v1831_v11 = vcombine.low %v381_v4, %v385_v7  ;;  %1951 = vmatpush3.bf16.msra.mxu1 %v1842_v19  ;;  %v1841_v46 = vcombine.low %v382_v44, %v386_v45  ;;  %v2428_v48 = vld [vmem:[%s2381_s19 + $0x1b0] sm:$0xff]  ;;  %v374_v51 = vld [vmem:[%s2381_s19 + $0x148] sm:$0xff]  ;;  %s2518_s12 = sshll.u32 %s2822_s25, 4  ;;  %vm1356_vm4 = vcmask 785408  }
  0x34   : > { %v377_v10 = vld [vmem:[%s2381_s19 + $0x160] sm:$0xff]  ;;  %488 = vmatpush1.bf16.msra.mxu0 %v1833_v6  ;;  %1952 = vmatprep.subr.bf16.mxu1 %v2261_v1  ;;  %v1856_v49 = vcombine.low %v2425_v47, %v2428_v48  ;;  %v1855_v50 = vcombine.high %v382_v44, %v386_v45  ;;  %v378_v52 = vld [vmem:[%s2381_s19 + $0x168] sm:$0xff]  ;;  %v2436_v54 = vld [vmem:[%s2381_s19 + $0x150] sm:$0xff]  ;;  %s2526_s16 = scalar_lea.vmem %s2810_s5, %s2518_s12  ;;  %s316_s21 = scalar_lea.vmem %s2805_s0, %s2518_s12 }
  0x35   : > { %489 = vmatprep.subr.bf16.mxu0 %v1832_v8  ;;  %v1830_v12 = vcombine.high %v373_v9, %v377_v10  ;;  %v365_v13 = vld [vmem:[%s2381_s19 + $0x100] sm:$0xff]  ;;  %v1829_v21 = vcombine.low %v373_v9, %v377_v10  ;;  %v1840_v53 = vcombine.low %v374_v51, %v378_v52  ;;  %v2439_v55 = vld [vmem:[%s2381_s19 + $0x170] sm:$0xff]  ;;  %v1853_v57 = vcombine.high %v374_v51, %v378_v52  ;;  %v366_v58 = vld [vmem:[%s2381_s19 + $0x108] sm:$0xff]  ;;  %s321_s7 = scalar_lea.vmem %s2806_s1, %s2518_s12  ;;  %s331_s30 = scalar_lea.vmem %s2811_s6, %s2518_s12 }
  0x36   : > { %v369_v14 = vld [vmem:[%s2381_s19 + $0x120] sm:$0xff]  ;;  %v1854_v56 = vcombine.low %v2436_v54, %v2439_v55  ;;  %v370_v59 = vld [vmem:[%s2381_s19 + $0x128] sm:$0xff]  ;;  %v2447_v61 = vld [vmem:[%s2381_s19 + $0x110] sm:$0xff]  ;;  %v1873_v8 = vcombine.high %v2425_v47, %v2428_v48  ;;  %v1872_v9 = vcombine.high %v2436_v54, %v2439_v55 }
  0x37   : > { %v1828_v22 = vcombine.high %v365_v13, %v369_v14  ;;  %v357_v23 = vld [vmem:[%s2381_s19 + $0xc0] sm:$0xff]  ;;  %v1827_v25 = vcombine.low %v365_v13, %v369_v14  ;;  %1953 = vmatpush3.bf16.msra.mxu1 %v1841_v46  ;;  %v1839_v60 = vcombine.low %v366_v58, %v370_v59  ;;  %v2450_v62 = vld [vmem:[%s2381_s19 + $0x130] sm:$0xff]  ;;  %v358_v2 = vld [vmem:[%s2381_s19 + $0xc8] sm:$0xff] }
  0x38   : > { %490 = vmatpush1.bf16.msra.mxu0 %v1831_v11  ;;  %v361_v24 = vld [vmem:[%s2381_s19 + $0xe0] sm:$0xff]  ;;  %1954 = vmatprep.subr.bf16.mxu1 %v2261_v1  ;;  %v1852_v63 = vcombine.low %v2447_v61, %v2450_v62  ;;  %v362_v3 = vld [vmem:[%s2381_s19 + $0xe8] sm:$0xff]  ;;  %v2458_v5 = vld [vmem:[%s2381_s19 + $0xd0] sm:$0xff]  ;;  %v1871_v10 = vcombine.high %v2447_v61, %v2450_v62 }
  0x39   : > { %491 = vmatprep.subr.bf16.mxu0 %v1830_v12  ;;  %v1826_v26 = vcombine.high %v357_v23, %v361_v24  ;;  %v349_v27 = vld [vmem:[%s2381_s19 + $0x80] sm:$0xff]  ;;  %v1825_v29 = vcombine.low %v357_v23, %v361_v24  ;;  %v1838_v4 = vcombine.low %v358_v2, %v362_v3  ;;  %v2461_v6 = vld [vmem:[%s2381_s19 + $0xf0] sm:$0xff]  ;;  %v1849_v11 = vcombine.high %v358_v2, %v362_v3  ;;  %v350_v12 = vld [vmem:[%s2381_s19 + $0x88] sm:$0xff] }
  0x3a   : > { %v353_v28 = vld [vmem:[%s2381_s19 + $0xa0] sm:$0xff]  ;;  %v1850_v7 = vcombine.low %v2458_v5, %v2461_v6  ;;  %v354_v13 = vld [vmem:[%s2381_s19 + $0xa8] sm:$0xff]  ;;  %v2474_v14 = vld [vmem:[%s2381_s19 + $0x90] sm:$0xff]  ;;  %v1870_v15 = vcombine.high %v2458_v5, %v2461_v6 }
  0x3b   : > { %v1824_v30 = vcombine.high %v349_v27, %v353_v28  ;;  %v341_v31 = vld [vmem:[%s2381_s19 + $0x40] sm:$0xff]  ;;  %v1823_v33 = vcombine.low %v349_v27, %v353_v28  ;;  %1955 = vmatpush3.bf16.msra.mxu1 %v1840_v53  ;;  %v1837_v16 = vcombine.low %v350_v12, %v354_v13  ;;  %v2480_v19 = vld [vmem:[%s2381_s19 + $0xb0] sm:$0xff]  ;;  %v1847_v23 = vcombine.high %v350_v12, %v354_v13 }
  0x3c   : > { %492 = vmatpush1.bf16.msra.mxu0 %v1829_v21  ;;  %v345_v32 = vld [vmem:[%s2381_s19 + $0x60] sm:$0xff]  ;;  %1956 = vmatprep.subr.bf16.mxu1 %v2261_v1  ;;  %v342_v21 = vld [vmem:[%s2381_s19 + $0x48] sm:$0xff]  ;;  %v1848_v24 = vcombine.low %v2474_v14, %v2480_v19  ;;  %v2492_v27 = vld [vmem:[%s2381_s19 + $0x70] sm:$0xff] }
  0x3d   : > { %493 = vmatprep.subr.bf16.mxu0 %v1828_v22  ;;  %v1822_v34 = vcombine.high %v341_v31, %v345_v32  ;;  %v333_v35 = vld [vmem:[%s2381_s19] sm:$0xff]  ;;  %v1821_v37 = vcombine.low %v341_v31, %v345_v32  ;;  %v346_v22 = vld [vmem:[%s2381_s19 + $0x68] sm:$0xff]  ;;  %v2501_v31 = vld [vmem:[%s2381_s19 + $0x10] sm:$0xff] }
  0x3e   : > { %v337_v36 = vld [vmem:[%s2381_s19 + $0x20] sm:$0xff]  ;;  %v2504_v32 = vld [vmem:[%s2381_s19 + $0x30] sm:$0xff] }
  0x3f   : > { %v1820_v38 = vcombine.high %v333_v35, %v337_v36  ;;  %v1819_v39 = vcombine.low %v333_v35, %v337_v36  ;;  %v401_v40 = vld [vmem:[%s2807_s2] sm:$0x3]  ;;  %1957 = vmatpush3.bf16.msra.mxu1 %v1839_v60  ;;  %v1867_v35 = vcombine.high %v2501_v31, %v2504_v32  ;;  %v1845_v36 = vcombine.high %v342_v21, %v346_v22 }
  0x40   : > { %494 = vmatpush1.bf16.msra.mxu0 %v1827_v25  ;;  %v402_v42 = vpack.c.bf16 %v401_v40, %v401_v40  ;;  %1958 = vmatprep.subr.bf16.mxu1 %v2261_v1  ;;  %v1869_v25 = vcombine.high %v2474_v14, %v2480_v19  ;;  %v528_v40 = vlaneseq  ;;  %v2532_v45 = vld [vmem:[%s2526_s16] sm:$0xff] }
  0x41   : > { %495 = vmatprep.subr.bf16.mxu0 %v1826_v26  ;;  %v2489_v26 = vld [vmem:[%s2381_s19 + $0x50] sm:$0xff]  ;;  %v2549_v3 = vld [vmem:[%s316_s21] sm:$0xff] }
  0x42   : > { %v1846_v28 = vcombine.low %v2489_v26, %v2492_v27 }
  0x43   : > { %1959 = vmatpush3.bf16.msra.mxu1 %v1838_v4 }
  0x44   : > { %496 = vmatpush1.bf16.msra.mxu0 %v1825_v29  ;;  %1960 = vmatprep.subr.bf16.mxu1 %v2261_v1  ;;  %v1868_v29 = vcombine.high %v2489_v26, %v2492_v27 }
  0x45   : > { %497 = vmatprep.subr.bf16.mxu0 %v1824_v30  ;;  %v1836_v30 = vcombine.low %v342_v21, %v346_v22  ;;  %v405_v21 = vld [vmem:[%s321_s7] sm:$0xff] }
  0x47   : > { %1961 = vmatpush3.bf16.msra.mxu1 %v1837_v16  ;;  %v2552_v16 = vld [vmem:[%s316_s21 + $0x8] sm:$0xff] }
  0x48   : > { %498 = vmatpush1.bf16.msra.mxu0 %v1823_v33  ;;  %1962 = vmatprep.subr.bf16.mxu1 %v2261_v1  ;;  %v334_v33 = vld [vmem:[%s2381_s19 + $0x8] sm:$0xff] }
  0x49   : > { %499 = vmatprep.subr.bf16.mxu0 %v1822_v34  ;;  %v338_v34 = vld [vmem:[%s2381_s19 + $0x28] sm:$0xff] }
  0x4b   : > { %1963 = vmatpush3.bf16.msra.mxu1 %v1836_v30  ;;  %v406_v30 = vld [vmem:[%s321_s7 + $0x8] sm:$0xff] }
  0x4c   : > { %500 = vmatpush1.bf16.msra.mxu0 %v1821_v37  ;;  %v1844_v37 = vcombine.low %v2501_v31, %v2504_v32  ;;  %1964 = vmatprep.subr.bf16.mxu1 %v2261_v1 }
  0x4d   : > { %501 = vmatprep.subr.bf16.mxu0 %v1820_v38  ;;  %v1835_v38 = vcombine.low %v334_v33, %v338_v34 }
  0x4f   : > { %1965 = vmatpush3.bf16.msra.mxu1 %v1835_v38 }
  0x50   : > { %502 = vmatpush1.bf16.msra.mxu0 %v1819_v39  ;;  %v1843_v39 = vcombine.high %v334_v33, %v338_v34  ;;  %1970 = vmatprep.subr.bf16.mxu1 %v2261_v1 }
  0x51   : > { %787 = vmatprep.subr.bf16.mxu0 %v1858_v41  ;;  %v2520_v41 = vshrl.u32 %v528_v40, 7 }
  0x53   : > { %520 = vmatmul.mubr.bf16.vlgmr.msra.gmra.mxu0 %v402_v42  ;;  %v2263_v42 = vmov 1966171168   ;;  %v2529_v44 = vsub.s32 0, %v2520_v41  ;;  %v832_v17 = vsub.s32 3, %v2520_v41  ;;  %v616_v5 = vsub.s32 2, %v2520_v41 }
  0x54   : > { %788 = vmatpush1.bf16.msra.mxu0 %v1857_v43  ;;  %819 = vmatprep.mubr.bf16.mxu0 %v2260_v0  ;;  %v1851_v0 = vcombine.high %v366_v58, %v370_v59  ;;  %v540_v43 = vunpack.c.l.s4 %v2263_v42 }
  0x55   : > { %789 = vmatprep.subr.bf16.mxu0 %v1856_v49  ;;  %v535_v49 = vsub.s32 1, %v2520_v41  ;;  %v833_v48 = vrot.slane %v2532_v45, %v832_v17  ;;  %v617_v14 = vrot.slane %v2532_v45, %v616_v5 }
  0x56   : > { %v541_v46 = vunpack.c.0.s8 %v540_v43 }
  0x57   : > { %v536_v52 = vrot.slane %v2532_v45, %v535_v49 }
  0x58   : > { %790 = vmatpush1.bf16.msra.mxu0 %v1855_v50  ;;  %v531_v50 = vrot.slane %v2532_v45, %v2529_v44  ;;  %v544_v51 = vsub.s32 %v541_v46, %v2520_v41 }
  0x59   : > { %791 = vmatprep.subr.bf16.mxu0 %v1854_v56 }
  0x5c   : > { %792 = vmatpush1.bf16.msra.mxu0 %v1853_v57 }
  0x5d   : > { %793 = vmatprep.subr.bf16.mxu0 %v1852_v63 }
  0x60   : > { %794 = vmatpush1.bf16.msra.mxu0 %v1851_v0 }
  0x61   : > { %795 = vmatprep.subr.bf16.mxu0 %v1850_v7 }
  0x64   : > { %796 = vmatpush1.bf16.msra.mxu0 %v1849_v11 }
  0x65   : > { %797 = vmatprep.subr.bf16.mxu0 %v1848_v24 }
  0x68   : > { %798 = vmatpush1.bf16.msra.mxu0 %v1847_v23 }
  0x69   : > { %799 = vmatprep.subr.bf16.mxu0 %v1846_v28 }
  0x6c   : > { %800 = vmatpush1.bf16.msra.mxu0 %v1845_v36 }
  0x6d   : > { %801 = vmatprep.subr.bf16.mxu0 %v1844_v37 }
  0x70   : > { %802 = vmatpush1.bf16.msra.mxu0 %v1843_v39 }
  0x71   : > { %2018 = vmatprep.subr.bf16.mxu0 %v2261_v1 }
 0x113   : > { %v521_v53 = vpop.f32.mrf.mxu0 }
 0x114   : > { %v532_v56 = vadd.f32 %v531_v50, %v521_v53  ;;  %v2629_v50 = vld [vmem:[%s2808_s3] sm:$0xff] }
 0x115   : > { %v523_v57 = vpop.f32.mrf.mxu0 }
 0x116   : > { %v545_v58 = vrot.slane %v532_v56, %v544_v51  ;;  %v537_v59 = vadd.f32 %v536_v52, %v523_v57  ;;  %v2635_v56 = vld [vmem:[%s2808_s3 + $0x8] sm:$0xff] }
 0x117   : > { %v525_v60 = vpop.f32.mrf.mxu0 }
 0x118   : > { %v546_v63 = vcombine.high %v545_v58, %v545_v58  ;;  %v553_v0 = vrot.slane %v545_v58, %v544_v51  ;;  %v582_v2 = vrot.slane %v537_v59, %v544_v51 }
 0x119   : > { %v526_v4 = vpop.f32.mrf.mxu0 }
 0x11a   : > { %v560_v7 = vrot.slane %v546_v63, %v544_v51  ;;  %v564_v11 = vrot.slane %v553_v0, %v2529_v44  ;;  %v583_v12 = vcombine.high %v582_v2, %v582_v2  ;;  %v590_v13 = vrot.slane %v582_v2, %v544_v51 }
 0x11c   : > { %v568_v22 = vrot.slane %v560_v7, %v2529_v44  ;;  %v571_v23 = vadd.f32 %v564_v11, %v2549_v3  ;;  %v597_v24 = vrot.slane %v583_v12, %v544_v51  ;;  %v601_v28 = vrot.slane %v590_v13, %v2529_v44 }
 0x11e   : > { %v572_v33 = vadd.f32 %v568_v22, %v2552_v16  ;;  %v605_v34 = vrot.slane %v597_v24, %v2529_v44  ;;  %v608_v36 = vadd.f32 %v601_v28, %v405_v21  ;;  %2141 = vtanh.f32 %v571_v23 }
 0x120   : > { %2143 = vtanh.f32 %v572_v33  ;;  %v609_v37 = vadd.f32 %v605_v34, %v406_v30 }
 0x121   : > { %2145 = vtanh.f32 %v608_v36 }
 0x122   : > { %2147 = vtanh.f32 %v609_v37 }
 0x12b   : > { %v2559_v38 = vpop.eup %2141 }
 0x12d   : > { %v2561_v39 = vpop.eup %2143 }
 0x12e   : > { %v2146_v40 = vpop.eup %2145  ;;  %v612_v42 = vpack.c.bf16 %v2561_v39, %v2559_v38 }
 0x12f   : > { %v2148_v43 = vpop.eup %2147 }
 0x130   : > { %1967 = vmatmul.mubr.bf16.vlgmr.msra.gmra.mxu1 %v612_v42  ;;  %v613_v46 = vpack.c.bf16 %v2148_v43, %v2146_v40 }
 0x131   : > { %1972 = vmatprep.mubr.msk.bf16.mxu1 %vm2262_vm0, %v2261_v1 }
 0x132   : > { %820 = vmatmul.mubr.bf16.vlgmr.msra.gmra.mxu0 %v613_v46 }
 0x133   : > { %2019 = vmatpush3.bf16.msra.mxu0 %v1874_v20  ;;  %2034 = vmatprep.mubr.msk.bf16.mxu0 %vm2262_vm0, %v2261_v1 }
 0x134   : > { %2020 = vmatprep.subr.bf16.mxu0 %v2261_v1 }
 0x137   : > { %2021 = vmatpush3.bf16.msra.mxu0 %v1873_v8 }
 0x138   : > { %2022 = vmatprep.subr.bf16.mxu0 %v2261_v1 }
 0x13b   : > { %2023 = vmatpush3.bf16.msra.mxu0 %v1872_v9  ;;  %v838_v9 = vsub.s32 4, %v2520_v41 }
 0x13c   : > { %2024 = vmatprep.subr.bf16.mxu0 %v2261_v1 }
 0x13f   : > { %2025 = vmatpush3.bf16.msra.mxu0 %v1871_v10 }
 0x140   : > { %2026 = vmatprep.subr.bf16.mxu0 %v2261_v1 }
 0x143   : > { %2027 = vmatpush3.bf16.msra.mxu0 %v1870_v15 }
 0x144   : > { %2028 = vmatprep.subr.bf16.mxu0 %v2261_v1 }
 0x147   : > { %2029 = vmatpush3.bf16.msra.mxu0 %v1869_v25  ;;  %v839_v25 = vrot.slane %v2532_v45, %v838_v9 }
 0x148   : > { %2030 = vmatprep.subr.bf16.mxu0 %v2261_v1 }
 0x14b   : > { %2031 = vmatpush3.bf16.msra.mxu0 %v1868_v29 }
 0x14c   : > { %2032 = vmatprep.subr.bf16.mxu0 %v2261_v1 }
 0x14f   : > { %2033 = vmatpush3.bf16.msra.mxu0 %v1867_v35 }
 0x150   : > { %2058 = vmatprep.subr.bf16.mxu0 %v2261_v1 }
 0x1f0   : > { %v700_v18 = vpop.f32.mrf.mxu1 }
 0x1f1   : > { %v701_v29 = vadd.f32 %v700_v18, %v617_v14 }
 0x1f2   : > { %v1968_v20 = vpop.f32.mrf.mxu1  ;;  %v821_v47 = vpop.f32.mrf.mxu0 }
 0x1f3   : > { %v834_v6 = vadd.f32 %v833_v48, %v821_v47 }
 0x1f4   : > { %v703_v54 = vpop.f32.mrf.mxu1  ;;  %v823_v55 = vpop.f32.mrf.mxu0 }
 0x1f5   : > { %v704_v26 = vadd.f32 %v703_v54, %v617_v14  ;;  %v840_v31 = vadd.f32 %v839_v25, %v823_v55 }
 0x1f6   : > { %v1969_v61 = vpop.f32.mrf.mxu1  ;;  %v825_v62 = vpop.f32.mrf.mxu0 }
 0x1f7   : > { %v835_v8 = vadd.f32 %v833_v48, %v825_v62  ;;  %v2616_v32 = vpack.c.bf16 %v704_v26, %v701_v29 }
 0x1f8   : > { %v827_v15 = vpop.f32.mrf.mxu0 }
 0x1f9   : > { %v2607_v10 = vpack.c.bf16 %v835_v8, %v834_v6  ;;  %v841_v27 = vadd.f32 %v839_v25, %v827_v15 }
 0x1fb   : > { %v850_v19 = vsel %vm845_vm1, %v2607_v10, 0  ;;  %v2618_v35 = vpack.c.bf16 %v841_v27, %v840_v31 }
 0x1fc   : > { %1971 = vmatpush3.bf16.xpose.msra.mxu1 %v850_v19 }
 0x1fd   : > { %1976 = vmatprep.subr.bf16.mxu1 %v2261_v1 }
 0x203   : > { %1973 = vmatmul.mubr.msk.bf16.vlgmr.msra.gmra.mxu1 %vm845_vm1, %v2616_v32 }
 0x204   : > { %1977 = vmatpush3.bf16.msra.mxu1 %v2618_v35  ;;  %1978 = vmatprep.mubr.msk.bf16.mxu1 %vm2262_vm0, %v2261_v1 }
 0x205   : > { %1982 = vmatprep.subr.bf16.mxu1 %v2261_v1 }
 0x2c3   : > { %v886_v51 = vpop.f32.mrf.mxu1 }
 0x2c4   : > { %v887_v52 = vadd.f32 %v886_v51, %v2629_v50 }
 0x2c5   : > { %v1974_v53 = vpop.f32.mrf.mxu1 }
 0x2c6   : > { %v894_v57 = vsel %vm893_vm2, %v887_v52, -inf }
 0x2c7   : > { %895 = vmax.xlane.f32.xlu0 %v894_v57  ;;  %v889_v58 = vpop.f32.mrf.mxu1 }
 0x2c8   : > { %v890_v59 = vadd.f32 %v889_v58, %v2635_v56 }
 0x2c9   : > { %v1975_v60 = vpop.f32.mrf.mxu1 }
 0x2ca   : > { %v897_v63 = vsel %vm893_vm2, %v890_v59, -inf }
 0x2cb   : > { %898 = vmax.xlane.f32.xlu0 %v897_v63 }
 0x2e1   : > { %965 = vrot.lane.b32.xlu0 %v2607_v10, %s2264_s13 }
 0x350   : > { %v896_v0 = vpop.xlane.xlu0 %895 }
 0x351   : > { %v900_v2 = vsub.f32 %v887_v52, %v896_v0 }
 0x353   : > { %v902_v4 = vmul.f32 1.442695, %v900_v2 }
 0x354   : > { %v899_v7 = vpop.xlane.xlu0 %898 }
 0x355   : > { %2149 = vpow2.f32 %v902_v4  ;;  %v901_v11 = vsub.f32 %v890_v59, %v899_v7 }
 0x357   : > { %v904_v12 = vmul.f32 1.442695, %v901_v11 }
 0x358   : > { %v966_v37 = vpop.permute.xlu0 %965 }
 0x359   : > { %2151 = vpow2.f32 %v904_v12  ;;  %v971_v42 = vsel %vm845_vm1, %v966_v37, 0 }
 0x362   : > { %v2150_v13 = vpop.eup %2149 }
 0x363   : > { %v906_v21 = vsel %vm893_vm2, %v2150_v13, 0.0 }
 0x364   : > { %907 = vadd.xlane.f32.xlu1 %v906_v21 }
 0x366   : > { %v2152_v22 = vpop.eup %2151 }
 0x367   : > { %v909_v23 = vsel %vm893_vm2, %v2152_v22, 0.0 }
 0x368   : > { %910 = vadd.xlane.f32.xlu1 %v909_v23 }
 0x379   : > { %962 = vrot.lane.b32.xlu1 %v2616_v32, %s2264_s13 }
 0x3ed   : > { %v908_v24 = vpop.xlane.xlu1 %907 }
 0x3ee   : > { %2153 = vrcp.f32 %v908_v24 }
 0x3f1   : > { %v911_v28 = vpop.xlane.xlu1 %910 }
 0x3f2   : > { %2155 = vrcp.f32 %v911_v28 }
 0x3f5   : > { %v963_v43 = vpop.permute.xlu1 %962 }
 0x3fb   : > { %v2154_v30 = vpop.eup %2153 }
 0x3fc   : > { %v914_v34 = vmul.f32 %v2154_v30, %v2150_v13 }
 0x3ff   : > { %v2156_v33 = vpop.eup %2155 }
 0x400   : > { %v915_v36 = vmul.f32 %v2156_v33, %v2152_v22 }
 0x402   : > { %v916_v40 = vpack.c.bf16 %v915_v36, %v914_v34 }
 0x404   : > { %1979 = vmatmul.mubr.msk.bf16.vlgmr.msra.gmra.mxu1 %vm893_vm2, %v916_v40 }
 0x405   : > { %1983 = vmatpush3.bf16.xpose.msra.mxu1 %v971_v42  ;;  %1984 = vmatprep.mubr.msk.bf16.mxu1 %vm2262_vm0, %v2261_v1 }
 0x406   : > { %1988 = vmatprep.subr.bf16.mxu1 %v2261_v1 }
 0x40c   : > { %1985 = vmatmul.mubr.msk.bf16.vlgmr.msra.gmra.mxu1 %vm845_vm1, %v963_v43 }
 0x40d   : > { %1990 = vmatprep.mubr.msk.bf16.mxu1 %vm2262_vm0, %v2261_v1 }
 0x4c4   : > { %v2654_v46 = vpop.f32.mrf.mxu1 }
 0x4c6   : > { %v1980_v18 = vpop.f32.mrf.mxu1 }
 0x4c8   : > { %v2656_v20 = vpop.f32.mrf.mxu1 }
 0x4ca   : > { %v1981_v47 = vpop.f32.mrf.mxu1 }
 0x4cc   : > { %v1007_v48 = vpop.f32.mrf.mxu1 }
 0x4cd   : > { %v1008_v54 = vadd.f32 %v1007_v48, %v2629_v50 }
 0x4ce   : > { %v1986_v55 = vpop.f32.mrf.mxu1 }
 0x4cf   : > { %v1014_v61 = vsel %vm893_vm2, %v1008_v54, -inf }
 0x4d0   : > { %1015 = vmax.xlane.f32.xlu1 %v1014_v61  ;;  %v1010_v62 = vpop.f32.mrf.mxu1 }
 0x4d1   : > { %v1011_v6 = vadd.f32 %v1010_v62, %v2635_v56 }
 0x4d2   : > { %v1987_v8 = vpop.f32.mrf.mxu1 }
 0x4d3   : > { %v1017_v9 = vsel %vm893_vm2, %v1011_v6, -inf }
 0x4d4   : > { %1018 = vmax.xlane.f32.xlu0 %v1017_v9 }
 0x559   : > { %v1016_v14 = vpop.xlane.xlu1 %1015 }
 0x55a   : > { %v1020_v15 = vsub.f32 %v1008_v54, %v1016_v14 }
 0x55c   : > { %v1022_v19 = vmul.f32 1.442695, %v1020_v15 }
 0x55d   : > { %v1019_v25 = vpop.xlane.xlu0 %1018 }
 0x55e   : > { %2157 = vpow2.f32 %v1022_v19  ;;  %v1021_v26 = vsub.f32 %v1011_v6, %v1019_v25 }
 0x560   : > { %v1024_v27 = vmul.f32 1.442695, %v1021_v26 }
 0x562   : > { %2159 = vpow2.f32 %v1024_v27 }
 0x56b   : > { %v2158_v29 = vpop.eup %2157 }
 0x56c   : > { %v1026_v31 = vsel %vm893_vm2, %v2158_v29, 0.0 }
 0x56d   : > { %1027 = vadd.xlane.f32.xlu0 %v1026_v31 }
 0x56f   : > { %v2160_v51 = vpop.eup %2159 }
 0x570   : > { %v1029_v52 = vsel %vm893_vm2, %v2160_v51, 0.0 }
 0x571   : > { %1030 = vadd.xlane.f32.xlu1 %v1029_v52 }
 0x582   : > { %1087 = vrot.lane.b32.xlu1 %v2607_v10, %s2265_s17 }
 0x583   : > { %1038 = vrot.lane.b32.xlu0 %v2618_v35, %s2264_s13 }
 0x586   : > { %1085 = vrot.lane.b32.xlu1 %v2616_v32, %s2265_s17 }
 0x5f6   : > { %v1028_v53 = vpop.xlane.xlu0 %1027 }
 0x5f7   : > { %2161 = vrcp.f32 %v1028_v53 }
 0x5fa   : > { %v1031_v57 = vpop.xlane.xlu1 %1030  ;;  %v1039_v58 = vpop.permute.xlu0 %1038 }
 0x5fb   : > { %2163 = vrcp.f32 %v1031_v57  ;;  %1989 = vmatpush3.bf16.msra.mxu1 %v1039_v58 }
 0x5fc   : > { %1994 = vmatprep.subr.bf16.mxu1 %v2261_v1 }
 0x5fe   : > { %v1088_v2 = vpop.permute.xlu1 %1087 }
 0x5ff   : > { %v1093_v7 = vsel %vm845_vm1, %v1088_v2, 0 }
 0x602   : > { %v1086_v11 = vpop.permute.xlu1 %1085 }
 0x604   : > { %v2162_v59 = vpop.eup %2161 }
 0x605   : > { %v1034_v63 = vmul.f32 %v2162_v59, %v2158_v29 }
 0x608   : > { %v2164_v60 = vpop.eup %2163 }
 0x609   : > { %v1035_v0 = vmul.f32 %v2164_v60, %v2160_v51 }
 0x60b   : > { %v1036_v4 = vpack.c.bf16 %v1035_v0, %v1034_v63 }
 0x60d   : > { %1991 = vmatmul.mubr.msk.bf16.vlgmr.msra.gmra.mxu1 %vm893_vm2, %v1036_v4 }
 0x60e   : > { %1995 = vmatpush3.bf16.xpose.msra.mxu1 %v1093_v7  ;;  %1996 = vmatprep.mubr.msk.bf16.mxu1 %vm2262_vm0, %v2261_v1 }
 0x60f   : > { %2000 = vmatprep.subr.bf16.mxu1 %v2261_v1 }
 0x615   : > { %1997 = vmatmul.mubr.msk.bf16.vlgmr.msra.gmra.mxu1 %vm845_vm1, %v1086_v11 }
 0x616   : > { %2002 = vmatprep.mubr.msk.bf16.mxu1 %vm2262_vm0, %v2261_v1 }
 0x6cd   : > { %v2679_v12 = vpop.f32.mrf.mxu1 }
 0x6cf   : > { %v1992_v13 = vpop.f32.mrf.mxu1 }
 0x6d1   : > { %v2681_v21 = vpop.f32.mrf.mxu1 }
 0x6d2   : > { %v2126_v22 = vpack.i.bf16 %v2681_v21, %v2679_v12 }
 0x6d3   : > { %v1993_v23 = vpop.f32.mrf.mxu1 }
 0x6d5   : > { %v1129_v24 = vpop.f32.mrf.mxu1 }
 0x6d6   : > { %v1130_v28 = vadd.f32 %v1129_v24, %v2629_v50 }
 0x6d7   : > { %v1998_v30 = vpop.f32.mrf.mxu1 }
 0x6d8   : > { %v1136_v33 = vsel %vm893_vm2, %v1130_v28, -inf }
 0x6d9   : > { %1137 = vmax.xlane.f32.xlu1 %v1136_v33  ;;  %v1132_v34 = vpop.f32.mrf.mxu1 }
 0x6da   : > { %v1133_v36 = vadd.f32 %v1132_v34, %v2635_v56 }
 0x6db   : > { %v1999_v37 = vpop.f32.mrf.mxu1 }
 0x6dc   : > { %v1139_v40 = vsel %vm893_vm2, %v1133_v36, -inf }
 0x6dd   : > { %1140 = vmax.xlane.f32.xlu0 %v1139_v40 }
 0x6ea   : > { %1159 = vrot.lane.b32.xlu1 %v2618_v35, %s2265_s17 }
 0x6ee   : > { %1206 = vrot.lane.b32.xlu1 %v2616_v32, %s2266_s18 }
 0x762   : > { %v1138_v42 = vpop.xlane.xlu1 %1137 }
 0x763   : > { %v1142_v43 = vsub.f32 %v1130_v28, %v1138_v42 }
 0x765   : > { %v1144_v18 = vmul.f32 1.442695, %v1142_v43 }
 0x766   : > { %v1160_v47 = vpop.permute.xlu1 %1159  ;;  %v1141_v48 = vpop.xlane.xlu0 %1140 }
 0x767   : > { %2165 = vpow2.f32 %v1144_v18  ;;  %v1143_v54 = vsub.f32 %v1133_v36, %v1141_v48  ;;  %2001 = vmatpush3.bf16.msra.mxu1 %v1160_v47 }
 0x768   : > { %2006 = vmatprep.subr.bf16.mxu1 %v2261_v1 }
 0x769   : > { %v1146_v55 = vmul.f32 1.442695, %v1143_v54 }
 0x76b   : > { %2167 = vpow2.f32 %v1146_v55 }
 0x774   : > { %v2166_v61 = vpop.eup %2165 }
 0x775   : > { %v1148_v62 = vsel %vm893_vm2, %v2166_v61, 0.0 }
 0x776   : > { %1149 = vadd.xlane.f32.xlu0 %v1148_v62 }
 0x778   : > { %v2168_v6 = vpop.eup %2167 }
 0x779   : > { %v1151_v8 = vsel %vm893_vm2, %v2168_v6, 0.0 }
 0x77a   : > { %1152 = vadd.xlane.f32.xlu0 %v1151_v8 }
 0x790   : > { %1208 = vrot.lane.b32.xlu0 %v2607_v10, %s2266_s18  ;;  %v1207_v10 = vpop.permute.xlu1 %1206 }
 0x7ff   : > { %v1150_v32 = vpop.xlane.xlu0 %1149 }
 0x800   : > { %2169 = vrcp.f32 %v1150_v32 }
 0x803   : > { %v1153_v9 = vpop.xlane.xlu0 %1152 }
 0x804   : > { %2171 = vrcp.f32 %v1153_v9 }
 0x807   : > { %v1209_v26 = vpop.permute.xlu0 %1208 }
 0x808   : > { %v1214_v29 = vsel %vm845_vm1, %v1209_v26, 0 }
 0x80d   : > { %v2170_v14 = vpop.eup %2169 }
 0x80e   : > { %v1156_v19 = vmul.f32 %v2170_v14, %v2166_v61 }
 0x811   : > { %v2172_v15 = vpop.eup %2171 }
 0x812   : > { %v1157_v25 = vmul.f32 %v2172_v15, %v2168_v6 }
 0x814   : > { %v1158_v27 = vpack.c.bf16 %v1157_v25, %v1156_v19 }
 0x816   : > { %2003 = vmatmul.mubr.msk.bf16.vlgmr.msra.gmra.mxu1 %vm893_vm2, %v1158_v27 }
 0x817   : > { %2007 = vmatpush3.bf16.xpose.msra.mxu1 %v1214_v29  ;;  %2008 = vmatprep.mubr.msk.bf16.mxu1 %vm2262_vm0, %v2261_v1 }
 0x818   : > { %2012 = vmatprep.subr.bf16.mxu1 %v2261_v1 }
 0x81e   : > { %2009 = vmatmul.mubr.msk.bf16.vlgmr.msra.gmra.mxu1 %vm845_vm1, %v1207_v10 }
 0x81f   : > { %2014 = vmatprep.mubr.msk.bf16.mxu1 %vm2262_vm0, %v2261_v1 }
 0x8d6   : > { %v1199_v31 = vpop.f32.mrf.mxu1 }
 0x8d8   : > { %v2004_v51 = vpop.f32.mrf.mxu1 }
 0x8d9   : > { %v1362_v51 = vsub.s32 5, %v2520_v41 }
 0x8da   : > { %v1202_v52 = vpop.f32.mrf.mxu1 }
 0x8db   : > { %v2131_v53 = vpack.i.bf16 %v1202_v52, %v1199_v31 }
 0x8dc   : > { %v2005_v57 = vpop.f32.mrf.mxu1 }
 0x8de   : > { %v1250_v58 = vpop.f32.mrf.mxu1 }
 0x8df   : > { %v1251_v59 = vadd.f32 %v1250_v58, %v2629_v50 }
 0x8e0   : > { %v2010_v60 = vpop.f32.mrf.mxu1 }
 0x8e1   : > { %v1257_v63 = vsel %vm893_vm2, %v1251_v59, -inf }
 0x8e2   : > { %1258 = vmax.xlane.f32.xlu1 %v1257_v63  ;;  %v1253_v0 = vpop.f32.mrf.mxu1 }
 0x8e3   : > { %v1254_v2 = vadd.f32 %v1253_v0, %v2635_v56  ;;  %v392_v0 = vld [vmem:[%s2381_s19 + $0x1d8] sm:$0xff] }
 0x8e4   : > { %v2011_v4 = vpop.f32.mrf.mxu1 }
 0x8e5   : > { %v1260_v7 = vsel %vm893_vm2, %v1254_v2, -inf }
 0x8e6   : > { %1261 = vmax.xlane.f32.xlu0 %v1260_v7 }
 0x96b   : > { %v1259_v11 = vpop.xlane.xlu1 %1258 }
 0x96c   : > { %v1263_v13 = vsub.f32 %v1251_v59, %v1259_v11 }
 0x96e   : > { %v1265_v23 = vmul.f32 1.442695, %v1263_v13 }
 0x96f   : > { %v1262_v24 = vpop.xlane.xlu0 %1261 }
 0x970   : > { %2173 = vpow2.f32 %v1265_v23  ;;  %v1264_v28 = vsub.f32 %v1254_v2, %v1262_v24  ;;  %v396_v2 = vld [vmem:[%s2381_s19 + $0x1f8] sm:$0xff] }
 0x971   : > { %v1882_v4 = vcombine.low %v392_v0, %v396_v2 }
 0x972   : > { %v1267_v30 = vmul.f32 1.442695, %v1264_v28 }
 0x974   : > { %2175 = vpow2.f32 %v1267_v30  ;;  %v384_v30 = vld [vmem:[%s2381_s19 + $0x198] sm:$0xff] }
 0x97d   : > { %v2174_v50 = vpop.eup %2173 }
 0x97e   : > { %v1269_v33 = vsel %vm893_vm2, %v2174_v50, 0.0 }
 0x97f   : > { %1270 = vadd.xlane.f32.xlu0 %v1269_v33 }
 0x981   : > { %v2176_v34 = vpop.eup %2175 }
 0x982   : > { %v1272_v36 = vsel %vm893_vm2, %v2176_v34, 0.0 }
 0x983   : > { %1273 = vadd.xlane.f32.xlu1 %v1272_v36  ;;  %v380_v36 = vld [vmem:[%s2381_s19 + $0x178] sm:$0xff] }
 0x994   : > { %2127 = vrot.lane.b32.xlu1 %v2126_v22, %s2266_s18 }
 0x995   : > { %1280 = vrot.lane.b32.xlu0 %v2618_v35, %s2266_s18 }
 0x998   : > { %2132 = vrot.lane.b32.xlu1 %v2131_v53, %s2265_s17 }
 0xa08   : > { %v1271_v56 = vpop.xlane.xlu0 %1270 }
 0xa09   : > { %2177 = vrcp.f32 %v1271_v56 }
 0xa0c   : > { %v1274_v37 = vpop.xlane.xlu1 %1273  ;;  %v1281_v40 = vpop.permute.xlu0 %1280 }
 0xa0d   : > { %2179 = vrcp.f32 %v1274_v37  ;;  %2013 = vmatpush3.bf16.msra.mxu1 %v1281_v40  ;;  %v368_v37 = vld [vmem:[%s2381_s19 + $0x118] sm:$0xff] }
 0xa0e   : > { %2038 = vmatprep.subr.bf16.mxu1 %v2261_v1  ;;  %v372_v40 = vld [vmem:[%s2381_s19 + $0x138] sm:$0xff] }
 0xa10   : > { %v2128_v55 = vpop.permute.xlu1 %2127 }
 0xa11   : > { %v2130_v62 = vunpack.i.h.bf16 %v2128_v55  ;;  %v2129_v6 = vunpack.i.l.bf16 %v2128_v55  ;;  %v336_v55 = vld [vmem:[%s2381_s19 + $0x18] sm:$0xff] }
 0xa13   : > { %v1352_v14 = vsel %vm845_vm1, %v2656_v20, %v2130_v62  ;;  %v1351_v15 = vsel %vm845_vm1, %v2654_v46, %v2129_v6  ;;  %v1363_v20 = vrot.slane %v2532_v45, %v1362_v51  ;;  %v1890_v6 = vcombine.high %v392_v0, %v396_v2 }
 0xa14   : > { %v2133_v61 = vpop.permute.xlu1 %2132 }
 0xa15   : > { %v2135_v8 = vunpack.i.h.bf16 %v2133_v61  ;;  %v2134_v32 = vunpack.i.l.bf16 %v2133_v61  ;;  %v340_v61 = vld [vmem:[%s2381_s19 + $0x38] sm:$0xff] }
 0xa16   : > { %v2178_v42 = vpop.eup %2177  ;;  %v1875_v62 = vcombine.low %v336_v55, %v340_v61 }
 0xa17   : > { %v1277_v18 = vmul.f32 %v2178_v42, %v2174_v50  ;;  %v1354_v26 = vsel %vm1353_vm3, %v1351_v15, %v2134_v32  ;;  %v1355_v27 = vsel %vm1353_vm3, %v1352_v14, %v2135_v8  ;;  %v388_v50 = vld [vmem:[%s2381_s19 + $0x1b8] sm:$0xff]  ;;  %v1879_v42 = vcombine.low %v368_v37, %v372_v40 }
 0xa18   : > { %v1881_v33 = vcombine.low %v384_v30, %v388_v50  ;;  %v1889_v8 = vcombine.high %v384_v30, %v388_v50 }
 0xa1a   : > { %v2180_v43 = vpop.eup %2179 }
 0xa1b   : > { %v1278_v47 = vmul.f32 %v2180_v43, %v2176_v34  ;;  %v376_v34 = vld [vmem:[%s2381_s19 + $0x158] sm:$0xff] }
 0xa1c   : > { %v1880_v56 = vcombine.low %v376_v34, %v380_v36  ;;  %v360_v43 = vld [vmem:[%s2381_s19 + $0xd8] sm:$0xff]  ;;  %v1888_v32 = vcombine.high %v376_v34, %v380_v36 }
 0xa1d   : > { %v1279_v48 = vpack.c.bf16 %v1278_v47, %v1277_v18  ;;  %v364_v18 = vld [vmem:[%s2381_s19 + $0xf8] sm:$0xff] }
 0xa1e   : > { %v1878_v47 = vcombine.low %v360_v43, %v364_v18  ;;  %v1886_v14 = vcombine.high %v360_v43, %v364_v18 }
 0xa1f   : > { %2015 = vmatmul.mubr.msk.bf16.vlgmr.msra.gmra.mxu1 %vm893_vm2, %v1279_v48  ;;  %v352_v48 = vld [vmem:[%s2381_s19 + $0x98] sm:$0xff] }
 0xa20   : > { %2054 = vmatprep.mubr.msk.bf16.mxu1 %vm2262_vm0, %v2261_v1  ;;  %2039 = vmatpush3.bf16.msra.mxu1 %v1882_v4 }
 0xa21   : > { %2040 = vmatprep.subr.bf16.mxu1 %v2261_v1 }
 0xa24   : > { %2041 = vmatpush3.bf16.msra.mxu1 %v1881_v33 }
 0xa25   : > { %2042 = vmatprep.subr.bf16.mxu1 %v2261_v1 }
 0xa28   : > { %2043 = vmatpush3.bf16.msra.mxu1 %v1880_v56 }
 0xa29   : > { %2044 = vmatprep.subr.bf16.mxu1 %v2261_v1 }
 0xa2c   : > { %2045 = vmatpush3.bf16.msra.mxu1 %v1879_v42 }
 0xa2d   : > { %2046 = vmatprep.subr.bf16.mxu1 %v2261_v1 }
 0xa30   : > { %2047 = vmatpush3.bf16.msra.mxu1 %v1878_v47 }
 0xa31   : > { %2048 = vmatprep.subr.bf16.mxu1 %v2261_v1 }
 0xadf   : > { %v1320_v35 = vpop.f32.mrf.mxu1 }
 0xae1   : > { %v2016_v12 = vpop.f32.mrf.mxu1 }
 0xae3   : > { %v1323_v21 = vpop.f32.mrf.mxu1 }
 0xae4   : > { %v2136_v22 = vpack.i.bf16 %v1323_v21, %v1320_v35  ;;  %v356_v35 = vld [vmem:[%s2381_s19 + $0xb8] sm:$0xff] }
 0xae5   : > { %v2017_v54 = vpop.f32.mrf.mxu1  ;;  %v1877_v12 = vcombine.low %v352_v48, %v356_v35  ;;  %v344_v21 = vld [vmem:[%s2381_s19 + $0x58] sm:$0xff]  ;;  %v1885_v2 = vcombine.high %v352_v48, %v356_v35 }
 0xae6   : > { %2137 = vrot.lane.b32.xlu1 %v2136_v22, %s2264_s13  ;;  %v348_v22 = vld [vmem:[%s2381_s19 + $0x78] sm:$0xff] }
 0xae7   : > { %2049 = vmatpush3.bf16.msra.mxu1 %v1877_v12  ;;  %v1876_v54 = vcombine.low %v344_v21, %v348_v22  ;;  %v1884_v4 = vcombine.high %v344_v21, %v348_v22 }
 0xae8   : > { %2050 = vmatprep.subr.bf16.mxu1 %v2261_v1 }
 0xaeb   : > { %2051 = vmatpush3.bf16.msra.mxu1 %v1876_v54 }
 0xaec   : > { %2052 = vmatprep.subr.bf16.mxu1 %v2261_v1 }
 0xaef   : > { %2053 = vmatpush3.bf16.msra.mxu1 %v1875_v62 }
 0xb58   : > { %v2138_v9 = vpop.permute.xlu1 %2137 }
 0xb59   : > { %v2140_v19 = vunpack.i.h.bf16 %v2138_v9  ;;  %v2139_v25 = vunpack.i.l.bf16 %v2138_v9  ;;  %v1887_v9 = vcombine.high %v368_v37, %v372_v40 }
 0xb5b   : > { %v1358_v29 = vsel %vm1356_vm4, %v1355_v27, %v2140_v19  ;;  %v1357_v10 = vsel %vm1356_vm4, %v1354_v26, %v2139_v25 }
 0xb5c   : > { %v1359_v31 = vpack.c.bf16 %v1358_v29, %v1357_v10  ;;  %v1464_v10 = vsub.s32 6, %v2520_v41 }
 0xb5e   : > { %2035 = vmatmul.mubr.bf16.vlgmr.msra.gmra.mxu0 %v1359_v31 }
 0xb5f   : > { %2074 = vmatprep.mubr.msk.bf16.mxu0 %vm2262_vm0, %v2261_v1  ;;  %2059 = vmatpush3.bf16.msra.mxu0 %v1890_v6 }
 0xb60   : > { %2060 = vmatprep.subr.bf16.mxu0 %v2261_v1 }
 0xb63   : > { %2061 = vmatpush3.bf16.msra.mxu0 %v1889_v8 }
 0xb64   : > { %2062 = vmatprep.subr.bf16.mxu0 %v2261_v1 }
 0xb67   : > { %2063 = vmatpush3.bf16.msra.mxu0 %v1888_v32 }
 0xb68   : > { %2064 = vmatprep.subr.bf16.mxu0 %v2261_v1 }
 0xb6b   : > { %2065 = vmatpush3.bf16.msra.mxu0 %v1887_v9 }
 0xb6c   : > { %2066 = vmatprep.subr.bf16.mxu0 %v2261_v1 }
 0xb6f   : > { %2067 = vmatpush3.bf16.msra.mxu0 %v1886_v14 }
 0xb70   : > { %2068 = vmatprep.subr.bf16.mxu0 %v2261_v1 }
 0xb73   : > { %2069 = vmatpush3.bf16.msra.mxu0 %v1885_v2 }
 0xb74   : > { %2070 = vmatprep.subr.bf16.mxu0 %v2261_v1 }
 0xb77   : > { %2071 = vmatpush3.bf16.msra.mxu0 %v1884_v4 }
 0xb78   : > { %2072 = vmatprep.subr.bf16.mxu0 %v2261_v1 }
 0xc1e   : > { %v1430_v52 = vpop.f32.mrf.mxu0 }
 0xc1f   : > { %v1431_v53 = vadd.f32 %v1430_v52, %v1363_v20  ;;  %v1470_v52 = vsub.s32 7, %v2520_v41 }
 0xc20   : > { %v2036_v46 = vpop.f32.mrf.mxu0 }
 0xc21   : > { %v1437_v57 = vadd.f32 %v2559_v38, %v1431_v53 }
 0xc22   : > { %v1433_v58 = vpop.f32.mrf.mxu0 }
 0xc23   : > { %v1434_v59 = vadd.f32 %v1433_v58, %v1363_v20  ;;  %1439 = vadd.xlane.f32.xlu0 %v1437_v57  ;;  %v1465_v20 = vrot.slane %v2532_v45, %v1464_v10  ;;  %v1471_v58 = vrot.slane %v2532_v45, %v1470_v52 }
 0xc24   : > { %v2037_v60 = vpop.f32.mrf.mxu0 }
 0xc25   : > { %v1438_v63 = vadd.f32 %v2561_v39, %v1434_v59 }
 0xc27   : > { %1441 = vadd.xlane.f32.xlu1 %v1438_v63 }
 0xcac   : > { %v1440_v7 = vpop.xlane.xlu0 %1439 }
 0xcad   : > { %v1444_v11 = vmul.f32 0.0078125, %v1440_v7  ;;  %v1883_v7 = vcombine.high %v336_v55, %v340_v61 }
 0xcaf   : > { %v2737_v38 = vsub.f32 %v1437_v57, %v1444_v11  ;;  %2073 = vmatpush3.bf16.msra.mxu0 %v1883_v7  ;;  %v398_v11 = vld [vmem:[%s2526_s16 + $0x8] sm:$0xf] }
 0xcb0   : > { %v1442_v13 = vpop.xlane.xlu1 %1441  ;;  %v1574_v34 = vrot.slane %v398_v11, %v535_v49  ;;  %v1675_v32 = vrot.slane %v398_v11, %v616_v5  ;;  %v1681_v14 = vrot.slane %v398_v11, %v832_v17 }
 0xcb1   : > { %v1445_v23 = vmul.f32 0.0078125, %v1442_v13  ;;  %v1448_v39 = vmul.f32 %v2737_v38, %v2737_v38 }
 0xcb3   : > { %v2741_v24 = vsub.f32 %v1438_v63, %v1445_v23  ;;  %1450 = vadd.xlane.f32.xlu0 %v1448_v39 }
 0xcb5   : > { %v1449_v28 = vmul.f32 %v2741_v24, %v2741_v24 }
 0xcb7   : > { %1452 = vadd.xlane.f32.xlu0 %v1449_v28 }
 0xd3c   : > { %v1451_v15 = vpop.xlane.xlu0 %1450 }
 0xd3d   : > { %v1454_v19 = vmul.f32 0.0078125, %v1451_v15 }
 0xd3f   : > { %v1456_v25 = vadd.f32 1e-05, %v1454_v19 }
 0xd40   : > { %v1453_v26 = vpop.xlane.xlu0 %1452 }
 0xd41   : > { %2181 = vrsqrt.f32 %v1456_v25  ;;  %v1455_v27 = vmul.f32 0.0078125, %v1453_v26 }
 0xd43   : > { %v1457_v29 = vadd.f32 1e-05, %v1455_v27 }
 0xd45   : > { %2183 = vrsqrt.f32 %v1457_v29 }
 0xd4e   : > { %v2182_v31 = vpop.eup %2181 }
 0xd4f   : > { %v1460_v51 = vmul.f32 %v2182_v31, %v2737_v38  ;;  %v1478_v38 = vrot.slane %v398_v11, %v2529_v44 }
 0xd51   : > { %v1466_v57 = vmul.f32 %v1465_v20, %v1460_v51 }
 0xd52   : > { %v2184_v53 = vpop.eup %2183 }
 0xd53   : > { %v1461_v46 = vmul.f32 %v2184_v53, %v2741_v24  ;;  %v1472_v60 = vadd.f32 %v1471_v58, %v1466_v57 }
 0xd55   : > { %v1467_v59 = vmul.f32 %v1465_v20, %v1461_v46 }
 0xd57   : > { %v1473_v63 = vadd.f32 %v1471_v58, %v1467_v59 }
 0xd59   : > { %v1474_v0 = vpack.c.bf16 %v1473_v63, %v1472_v60 }
 0xd5b   : > { %2055 = vmatmul.mubr.bf16.vlgmr.msra.gmra.mxu1 %v1474_v0 }
 0xe1b   : > { %v1561_v13 = vpop.f32.mrf.mxu1 }
 0xe1c   : > { %v1562_v23 = vadd.f32 %v1561_v13, %v1478_v38 }
 0xe1d   : > { %v2056_v45 = vpop.f32.mrf.mxu1 }
 0xe1e   : > { %v1568_v30 = vmax.f32 %v1562_v23, 0.0 }
 0xe1f   : > { %v1564_v39 = vpop.f32.mrf.mxu1 }
 0xe20   : > { %v1565_v24 = vadd.f32 %v1564_v39, %v1478_v38 }
 0xe21   : > { %v2057_v28 = vpop.f32.mrf.mxu1 }
 0xe22   : > { %v1569_v50 = vmax.f32 %v1565_v24, 0.0 }
 0xe24   : > { %v1570_v33 = vpack.c.bf16 %v1569_v50, %v1568_v30 }
 0xe26   : > { %2075 = vmatmul.mubr.bf16.vlgmr.msra.gmra.mxu0 %v1570_v33 }
 0xee6   : > { %v1641_v36 = vpop.f32.mrf.mxu0 }
 0xee7   : > { %v1642_v1 = vadd.f32 %v1641_v36, %v1574_v34 }
 0xee8   : > { %v2076_v56 = vpop.f32.mrf.mxu0 }
 0xee9   : > { %v1648_v37 = vadd.f32 %v1642_v1, %v1472_v60 }
 0xeea   : > { %v1644_v40 = vpop.f32.mrf.mxu0 }
 0xeeb   : > { %v1645_v42 = vadd.f32 %v1644_v40, %v1574_v34  ;;  %1650 = vadd.xlane.f32.xlu0 %v1648_v37 }
 0xeec   : > { %v2077_v44 = vpop.f32.mrf.mxu0 }
 0xeed   : > { %v1649_v43 = vadd.f32 %v1645_v42, %v1473_v63 }
 0xeef   : > { %1652 = vadd.xlane.f32.xlu1 %v1649_v43 }
 0xf74   : > { %v1651_v18 = vpop.xlane.xlu0 %1650 }
 0xf75   : > { %v1654_v47 = vmul.f32 0.0078125, %v1651_v18 }
 0xf77   : > { %v1656_v48 = vsub.f32 %v1648_v37, %v1654_v47 }
 0xf78   : > { %v1653_v35 = vpop.xlane.xlu1 %1652 }
 0xf79   : > { %v1655_v12 = vmul.f32 0.0078125, %v1653_v35  ;;  %v1658_v21 = vmul.f32 %v1656_v48, %v1656_v48 }
 0xf7b   : > { %v1657_v22 = vsub.f32 %v1649_v43, %v1655_v12  ;;  %1660 = vadd.xlane.f32.xlu0 %v1658_v21 }
 0xf7d   : > { %v1659_v54 = vmul.f32 %v1657_v22, %v1657_v22 }
 0xf7f   : > { %1662 = vadd.xlane.f32.xlu1 %v1659_v54 }
0x1004   : > { %v1661_v49 = vpop.xlane.xlu0 %1660 }
0x1005   : > { %v1664_v55 = vmul.f32 0.0078125, %v1661_v49 }
0x1007   : > { %v1666_v61 = vadd.f32 1e-05, %v1664_v55 }
0x1008   : > { %v1663_v62 = vpop.xlane.xlu1 %1662 }
0x1009   : > { %2185 = vrsqrt.f32 %v1666_v61  ;;  %v1665_v6 = vmul.f32 0.0078125, %v1663_v62 }
0x100b   : > { %v1667_v8 = vadd.f32 1e-05, %v1665_v6 }
0x100d   : > { %2187 = vrsqrt.f32 %v1667_v8 }
0x1016   : > { %v2186_v9 = vpop.eup %2185 }
0x1017   : > { %v1670_v15 = vmul.f32 %v2186_v9, %v1656_v48 }
0x1019   : > { %v1676_v19 = vmul.f32 %v1675_v32, %v1670_v15 }
0x101a   : > { %v2188_v25 = vpop.eup %2187 }
0x101b   : > { %v1682_v26 = vadd.f32 %v1681_v14, %v1676_v19  ;;  %v1671_v27 = vmul.f32 %v2188_v25, %v1657_v22 }
0x101d   : > { %v1684_v29 = vadd.f32 %v1682_v26, %v2549_v3  ;;  %v1677_v10 = vmul.f32 %v1675_v32, %v1671_v27 }
0x101f   : > { %v1686_v31 = vmul.f32 %v1684_v29, %v1684_v29  ;;  %v1683_v51 = vadd.f32 %v1681_v14, %v1677_v10 }
0x1021   : > { %1688 = vadd.xlane.f32.xlu0 %v1686_v31  ;;  %v1685_v20 = vadd.f32 %v1683_v51, %v2552_v16 }
0x1023   : > { %v1687_v52 = vmul.f32 %v1685_v20, %v1685_v20 }
0x1025   : > { %1690 = vadd.xlane.f32.xlu1 %v1687_v52 }
0x10aa   : > { %v1689_v5 = vpop.xlane.xlu0 %1688 }
0x10ab   : > { %v1692_v53 = vmax.f32 %v1689_v5, 1e-24 }
0x10ad   : > { %2189 = vrsqrt.f32 %v1692_v53 }
0x10ae   : > { %v1691_v41 = vpop.xlane.xlu1 %1690 }
0x10af   : > { %v1693_v17 = vmax.f32 %v1691_v41, 1e-24 }
0x10b1   : > { %2191 = vrsqrt.f32 %v1693_v17 }
0x10ba   : > { %v2190_v46 = vpop.eup %2189 }
0x10bb   : > { %v1696_v3 = vmul.f32 %v2190_v46, %v1684_v29 }
0x10bd   : > { %1698 = vst [vmem:[%s331_s30] sm:$0xff] %v1696_v3 }
0x10be   : > { %v2192_v57 = vpop.eup %2191 }
0x10bf   : > { %v1697_v58 = vmul.f32 %v2192_v57, %v1685_v20 }
0x10c1   : > { %1699 = vst [vmem:[%s331_s30 + $0x8] sm:$0xff] %v1697_v58 }
0x10c2 PF: > { %p16_p9 = scmp.ge.s32.totalorder %s2324_s26, 4   ;;  %s2817_s21 = smov %s2247_s22 }
0x10c3   : > { %s2818_s22 = smov %s2251_s23  ;;  %s2819_s23 = smov %s2334_s29 }
0x10c4   : > { %s2820_s24 = smov %s2324_s26  ;;  %18 = sbr.rel (!%p16_p9) target bundleno = 3 (0x3), region = 93 }
0x10c9   :  { %1721 = vsyncpa [#allocation3], 1 }
0x10ca   :  { %1723 = vsyncpa [#allocation3 + $0x1], 1 }

</bundles_post_ra>
